<compile_context>
chip_gen: v5e
topology: v5e:2x2
jax: 0.10.0
libtpu: 0.0.40
codegen_flags: <defaults>
</compile_context>

<pallas_src>
import math
import functools

import numpy as np
import jax
import jax.numpy as jnp
from jax import lax
from jax.experimental import pallas as pl
from jax.experimental.pallas import tpu as pltpu


# --------------------------------------------------------------------------
# Host-side construction of the 1-D upfirdn operators (upsample x2 + blur + pad)
# --------------------------------------------------------------------------
def _upfir1d_matrix(blur_k, n, factor=2):
    """Return (factor*n, n) matrix applying 1-D upfirdn (up=factor, Upsample pad)."""
    k = np.asarray(blur_k, np.float64)
    assert k.ndim == 1
    # TODO(synk): a non-separable 2-D blur kernel cannot be factorized into L/R;
    # the default StyleGAN2 make_kernel([1,3,3,1]) path is always separable.
    a = k / k.sum() * factor                 # 1-D factor of make_kernel(k)*factor**2
    K = k.shape[0]
    p = K - factor
    pad0 = (p + 1) // 2 + factor - 1
    pad1 = p // 2
    out_len = n * factor + pad0 + pad1 - K + 1
    assert out_len == n * factor
    i = np.arange(out_len)[:, None]
    j = np.arange(n)[None, :]
    m = pad0 + factor * j - i                # tap index into the flipped kernel
    valid = (m >= 0) & (m < K)
    taps = a[np.clip(K - 1 - m, 0, K - 1)]
    return np.where(valid, taps, 0.0).astype(np.float32)


def _pick_row_tile(H):
    if H <= 16:
        return H
    for th in (16, 8):
        if H % th == 0:
            return th
    return H


def _pick_hw_tile(HW):
    if HW <= 8192:
        return HW
    return 8192 if HW % 8192 == 0 else HW


# --------------------------------------------------------------------------
# Fused kernel: modulation + modulated 1x1 conv + rgb bias + 2x upsample(skip)
# --------------------------------------------------------------------------
def _torgb_fused_kernel(style_ref, x_ref, skip_ref, l_ref, r_ref,
                        modw_ref, modb_ref, convw_ref, bias_ref, o_ref, *, th):
    # EqualLinear (scale folded into modw on host), bias_init = 1.
    s = jnp.dot(style_ref[0], modw_ref[...],
                preferred_element_type=jnp.float32) + modb_ref[...]        # (1, C)
    wmod = convw_ref[...] * s                                              # (3, C)

    # 2x FIR upsample of skip for this output-row tile:  L_tile @ skip_c @ R
    # (boundary zero-padding is encoded inside L / R, skip arrives unpadded).
    for c in range(3):
        tmp = jnp.dot(l_ref[...], skip_ref[0, c, :, :],
                      preferred_element_type=jnp.float32)                  # (th, ws)
        o_ref[0, c, :, :] = jnp.dot(tmp, r_ref[...],
                                    preferred_element_type=jnp.float32)    # (th, W)

    # Modulated 1x1 conv + rgb bias, one output row at a time (all-2D matmuls,
    # lane dim stays W), accumulated into the upsample rows already in VMEM.
    for j in range(th):
        cj = jnp.dot(wmod, x_ref[0, :, j, :],
                     preferred_element_type=jnp.float32)                   # (3, W)
        o_ref[0, :, j, :] = o_ref[0, :, j, :] + cj + bias_ref[...]


def _conv_rgb_fused_upsample(x, style3, skip, modw_t, modb2, convw_s, bias2, blur_k):
    B, C, H, W = x.shape
    S = style3.shape[2]
    hs, ws = skip.shape[2], skip.shape[3]
    assert (H, W) == (2 * hs, 2 * ws)

    L = jnp.asarray(_upfir1d_matrix(blur_k, hs))        # (H, hs)
    R = jnp.asarray(_upfir1d_matrix(blur_k, ws).T)      # (ws, W)
    th = _pick_row_tile(H)

    kern = functools.partial(_torgb_fused_kernel, th=th)
    out = pl.pallas_call(
        kern,
        out_shape=jax.ShapeDtypeStruct((B, 3, H, W), jnp.float32),
        grid_spec=pltpu.PrefetchScalarGridSpec(
            num_scalar_prefetch=0,
            grid=(B, H // th),
            in_specs=[
                pl.BlockSpec((1, 1, S), lambda b, t: (b, 0, 0)),           # style
                pl.BlockSpec((1, C, th, W), lambda b, t: (b, 0, t, 0)),    # x row tile
                pl.BlockSpec((1, 3, hs, ws), lambda b, t: (b, 0, 0, 0)),   # skip (whole)
                pl.BlockSpec((th, hs), lambda b, t: (t, 0)),               # L rows
                pl.BlockSpec((ws, W), lambda b, t: (0, 0)),                # R
                pl.BlockSpec((S, C), lambda b, t: (0, 0)),                 # mod weight^T
                pl.BlockSpec((1, C), lambda b, t: (0, 0)),                 # mod bias
                pl.BlockSpec((3, C), lambda b, t: (0, 0)),                 # conv weight
                pl.BlockSpec((3, 1), lambda b, t: (0, 0)),                 # rgb bias
            ],
            out_specs=pl.BlockSpec((1, 3, th, W), lambda b, t: (b, 0, t, 0)),
        ),
        compiler_params=pltpu.CompilerParams(
            dimension_semantics=("parallel", "parallel"),
            vmem_limit_bytes=64 * 1024 * 1024),
    )(style3, x, skip, L, R, modw_t, modb2, convw_s, bias2)
    return out


# --------------------------------------------------------------------------
# skip=None path: modulation + modulated 1x1 conv + rgb bias (flat, lane-dense)
# --------------------------------------------------------------------------
def _torgb_noskip_kernel(style_ref, x_ref, modw_ref, modb_ref, convw_ref,
                         bias_ref, o_ref):
    s = jnp.dot(style_ref[0], modw_ref[...],
                preferred_element_type=jnp.float32) + modb_ref[...]        # (1, C)
    wmod = convw_ref[...] * s                                              # (3, C)
    o_ref[0] = jnp.dot(wmod, x_ref[0],
                       preferred_element_type=jnp.float32) + bias_ref[...]


def _conv_rgb_noskip(x, style3, modw_t, modb2, convw_s, bias2):
    B, C, H, W = x.shape
    S = style3.shape[2]
    HW = H * W
    thw = _pick_hw_tile(HW)
    x2 = x.reshape(B, C, HW)                  # contiguous view, no data movement

    out = pl.pallas_call(
        _torgb_noskip_kernel,
        out_shape=jax.ShapeDtypeStruct((B, 3, HW), jnp.float32),
        grid_spec=pltpu.PrefetchScalarGridSpec(
            num_scalar_prefetch=0,
            grid=(B, HW // thw),
            in_specs=[
                pl.BlockSpec((1, 1, S), lambda b, t: (b, 0, 0)),
                pl.BlockSpec((1, C, thw), lambda b, t: (b, 0, t)),
                pl.BlockSpec((S, C), lambda b, t: (0, 0)),
                pl.BlockSpec((1, C), lambda b, t: (0, 0)),
                pl.BlockSpec((3, C), lambda b, t: (0, 0)),
                pl.BlockSpec((3, 1), lambda b, t: (0, 0)),
            ],
            out_specs=pl.BlockSpec((1, 3, thw), lambda b, t: (b, 0, t)),
        ),
        compiler_params=pltpu.CompilerParams(
            dimension_semantics=("parallel", "parallel"),
            vmem_limit_bytes=64 * 1024 * 1024),
    )(style3, x2, modw_t, modb2, convw_s, bias2)
    return out.reshape(B, 3, H, W)


# --------------------------------------------------------------------------
# ToRGB forward
# --------------------------------------------------------------------------
def to_rgb_forward(x, style, skip, params):
    B, C, H, W = x.shape
    S = style.shape[1]
    # Fold the static EqualLinear / conv scales into the weights (host side).
    modw_t = (params["mod_w"] * (1.0 / math.sqrt(S))).T       # (S, C)
    modb2 = params["mod_b"].reshape(1, C)
    convw_s = params["conv_w"] * (1.0 / math.sqrt(C))         # (3, C), fan_in=C*1*1
    bias2 = params["rgb_bias"].reshape(3, 1)
    style3 = style.reshape(B, 1, S)

    if skip is None:
        return _conv_rgb_noskip(x, style3, modw_t, modb2, convw_s, bias2)
    return _conv_rgb_fused_upsample(x, style3, skip, modw_t, modb2, convw_s,
                                    bias2, params["blur_k"])


# --------------------------------------------------------------------------
# Pure-JAX reference (correctness check only)
# --------------------------------------------------------------------------
def to_rgb_reference(x, style, skip, params):
    B, C, H, W = x.shape
    S = style.shape[1]
    s = style @ (params["mod_w"] * (1.0 / math.sqrt(S))).T + params["mod_b"]  # (B, C)
    w = (1.0 / math.sqrt(C)) * params["conv_w"][None] * s[:, None, :]          # (B, 3, C)
    out = jnp.einsum("boc,bchw->bohw", w, x) + params["rgb_bias"].reshape(1, 3, 1, 1)
    if skip is not None:
        k = np.asarray(params["blur_k"], np.float32)
        fir = np.outer(k, k)
        fir = fir / fir.sum() * 4.0                       # make_kernel(k) * factor**2
        wk = jnp.tile(jnp.asarray(np.flip(fir, (0, 1)).copy())[None, None],
                      (3, 1, 1, 1))
        skip_up = lax.conv_general_dilated(
            skip, wk, window_strides=(1, 1),
            padding=((2, 2), (2, 2)),                     # == upfirdn pad (2,1)
            lhs_dilation=(2, 2), rhs_dilation=(1, 1),
            dimension_numbers=("NCHW", "OIHW", "NCHW"),
            feature_group_count=3)
        out = out + skip_up
    return out


if __name__ == "__main__":
    B, C, S, H, W = 2, 4, 8, 16, 16
    key = jax.random.PRNGKey(0)
    k1, k2, k3, k4, k5, k6 = jax.random.split(key, 6)

    params = dict(
        conv_w=jax.random.normal(k1, (3, C), jnp.float32),   # (1,3,C,1,1) squeezed
        mod_w=jax.random.normal(k2, (C, S), jnp.float32),    # EqualLinear weight
        mod_b=jnp.ones((C,), jnp.float32),                   # bias_init = 1
        rgb_bias=0.1 * jax.random.normal(k6, (3,), jnp.float32),
        blur_k=(1, 3, 3, 1),                                 # Upsample blur kernel
    )

    x = jax.random.normal(k3, (B, C, H, W), jnp.float32)
    style = jax.random.normal(k4, (B, S), jnp.float32)
    skip = jax.random.normal(k5, (B, 3, H // 2, W // 2), jnp.float32)

    # skip path (fused conv + bias + 2x FIR upsample-add)
    out = jax.block_until_ready(to_rgb_forward(x, style, skip, params))
    ref = to_rgb_reference(x, style, skip, params)
    assert out.shape == (B, 3, H, W)
    err = float(jnp.max(jnp.abs(out - ref)))
    assert err < 1e-3, f"max abs err {err}"

    # skip=None path
    out_ns = jax.block_until_ready(to_rgb_forward(x, style, None, params))
    ref_ns = to_rgb_reference(x, style, None, params)
    err_ns = float(jnp.max(jnp.abs(out_ns - ref_ns)))
    assert err_ns < 1e-3, f"max abs err (no skip) {err_ns}"

    print("KERNEL_OK")
</pallas_src>

<mosaic_0001>
module attributes {stable_mosaic.version = 11 : i64} {
  func.func @_torgb_fused_kernel(%arg0: i32, %arg1: i32, %arg2: memref<1x1x8xf32, #tpu.memory_space<vmem>>, %arg3: memref<1x4x16x16xf32, #tpu.memory_space<vmem>>, %arg4: memref<1x3x8x8xf32, #tpu.memory_space<vmem>>, %arg5: memref<16x8xf32, #tpu.memory_space<vmem>>, %arg6: memref<8x16xf32, #tpu.memory_space<vmem>>, %arg7: memref<8x4xf32, #tpu.memory_space<vmem>>, %arg8: memref<1x4xf32, #tpu.memory_space<vmem>>, %arg9: memref<3x4xf32, #tpu.memory_space<vmem>>, %arg10: memref<3x1xf32, #tpu.memory_space<vmem>>, %arg11: memref<1x3x16x16xf32, #tpu.memory_space<vmem>>) attributes {dimension_semantics = [#tpu.dimension_semantics<parallel>, #tpu.dimension_semantics<parallel>], iteration_bounds = array<i64: 2, 1>, scalar_prefetch = 0 : i64, scratch_operands = 0 : i64, tpu.core_type = #tpu.core_type<tc>, window_params = [{transform_indices = @transform_0, window_bounds = array<i64: 1, 1, 8>}, {transform_indices = @transform_1, window_bounds = array<i64: 1, 4, 16, 16>}, {transform_indices = @transform_2, window_bounds = array<i64: 1, 3, 8, 8>}, {transform_indices = @transform_3, window_bounds = array<i64: 16, 8>}, {pipeline_mode = #tpu.pipeline_mode<synchronous>, transform_indices = @transform_4, window_bounds = array<i64: 8, 16>}, {pipeline_mode = #tpu.pipeline_mode<synchronous>, transform_indices = @transform_5, window_bounds = array<i64: 8, 4>}, {pipeline_mode = #tpu.pipeline_mode<synchronous>, transform_indices = @transform_6, window_bounds = array<i64: 1, 4>}, {pipeline_mode = #tpu.pipeline_mode<synchronous>, transform_indices = @transform_7, window_bounds = array<i64: 3, 4>}, {pipeline_mode = #tpu.pipeline_mode<synchronous>, transform_indices = @transform_8, window_bounds = array<i64: 3, 1>}, {transform_indices = @transform_9, window_bounds = array<i64: 1, 3, 16, 16>}]} {
    %c0 = arith.constant 0 : index
    %c0_0 = arith.constant 0 : index
    %c0_1 = arith.constant 0 : index
    %0 = vector.load %arg2[%c0, %c0_0, %c0_1] : memref<1x1x8xf32, #tpu.memory_space<vmem>>, vector<1x1x8xf32>
    %1 = vector.shape_cast %0 : vector<1x1x8xf32> to vector<1x8xf32>
    %c0_2 = arith.constant 0 : index
    %c0_3 = arith.constant 0 : index
    %2 = vector.load %arg7[%c0_2, %c0_3] : memref<8x4xf32, #tpu.memory_space<vmem>>, vector<8x4xf32>
    %cst = arith.constant dense<0.000000e+00> : vector<1x4xf32>
    %3 = tpu.matmul %1, %2, %cst {dimension_numbers = #tpu.dot_dimension_numbers<[1], [0], [0], [1], [0, 0, 1, 1], [], []>} : vector<1x8xf32>, vector<8x4xf32>, vector<1x4xf32> -> vector<1x4xf32>
    %c0_4 = arith.constant 0 : index
    %c0_5 = arith.constant 0 : index
    %4 = vector.load %arg8[%c0_4, %c0_5] : memref<1x4xf32, #tpu.memory_space<vmem>>, vector<1x4xf32>
    %5 = arith.addf %3, %4 : vector<1x4xf32>
    %c0_6 = arith.constant 0 : index
    %c0_7 = arith.constant 0 : index
    %6 = vector.load %arg9[%c0_6, %c0_7] : memref<3x4xf32, #tpu.memory_space<vmem>>, vector<3x4xf32>
    %7 = vector.broadcast %5 : vector<1x4xf32> to vector<3x4xf32>
    %8 = arith.mulf %6, %7 : vector<3x4xf32>
    %c0_8 = arith.constant 0 : index
    %c0_9 = arith.constant 0 : index
    %9 = vector.load %arg5[%c0_8, %c0_9] : memref<16x8xf32, #tpu.memory_space<vmem>>, vector<16x8xf32>
    %c0_10 = arith.constant 0 : index
    %c0_11 = arith.constant 0 : index
    %c0_12 = arith.constant 0 : index
    %c0_13 = arith.constant 0 : index
    %10 = vector.load %arg4[%c0_10, %c0_11, %c0_12, %c0_13] : memref<1x3x8x8xf32, #tpu.memory_space<vmem>>, vector<1x1x8x8xf32>
    %11 = vector.shape_cast %10 : vector<1x1x8x8xf32> to vector<8x8xf32>
    %cst_14 = arith.constant dense<0.000000e+00> : vector<16x8xf32>
    %12 = tpu.matmul %9, %11, %cst_14 {dimension_numbers = #tpu.dot_dimension_numbers<[1], [0], [0], [1], [0, 0, 1, 1], [], []>} : vector<16x8xf32>, vector<8x8xf32>, vector<16x8xf32> -> vector<16x8xf32>
    %c0_15 = arith.constant 0 : index
    %c0_16 = arith.constant 0 : index
    %13 = vector.load %arg6[%c0_15, %c0_16] : memref<8x16xf32, #tpu.memory_space<vmem>>, vector<8x16xf32>
    %cst_17 = arith.constant dense<0.000000e+00> : vector<16x16xf32>
    %14 = tpu.matmul %12, %13, %cst_17 {dimension_numbers = #tpu.dot_dimension_numbers<[1], [0], [0], [1], [0, 0, 1, 1], [], []>} : vector<16x8xf32>, vector<8x16xf32>, vector<16x16xf32> -> vector<16x16xf32>
    %c0_18 = arith.constant 0 : index
    %c0_19 = arith.constant 0 : index
    %c0_20 = arith.constant 0 : index
    %c0_21 = arith.constant 0 : index
    %15 = vector.load %arg11[%c0_18, %c0_19, %c0_20, %c0_21] : memref<1x3x16x16xf32, #tpu.memory_space<vmem>>, vector<1x1x16x16xf32>
    %16 = vector.shape_cast %15 : vector<1x1x16x16xf32> to vector<16x16xf32>
    %17 = vector.shape_cast %14 : vector<16x16xf32> to vector<1x1x16x16xf32>
    tpu.vector_store %arg11[%c0_18, %c0_19, %c0_20, %c0_21], %17 {strides = array<i32>} : memref<1x3x16x16xf32, #tpu.memory_space<vmem>>, vector<1x1x16x16xf32>,
    %c0_22 = arith.constant 0 : index
    %c0_23 = arith.constant 0 : index
    %18 = vector.load %arg5[%c0_22, %c0_23] : memref<16x8xf32, #tpu.memory_space<vmem>>, vector<16x8xf32>
    %c0_24 = arith.constant 0 : index
    %c1 = arith.constant 1 : index
    %c0_25 = arith.constant 0 : index
    %c0_26 = arith.constant 0 : index
    %19 = vector.load %arg4[%c0_24, %c1, %c0_25, %c0_26] : memref<1x3x8x8xf32, #tpu.memory_space<vmem>>, vector<1x1x8x8xf32>
    %20 = vector.shape_cast %19 : vector<1x1x8x8xf32> to vector<8x8xf32>
    %cst_27 = arith.constant dense<0.000000e+00> : vector<16x8xf32>
    %21 = tpu.matmul %18, %20, %cst_27 {dimension_numbers = #tpu.dot_dimension_numbers<[1], [0], [0], [1], [0, 0, 1, 1], [], []>} : vector<16x8xf32>, vector<8x8xf32>, vector<16x8xf32> -> vector<16x8xf32>
    %c0_28 = arith.constant 0 : index
    %c0_29 = arith.constant 0 : index
    %22 = vector.load %arg6[%c0_28, %c0_29] : memref<8x16xf32, #tpu.memory_space<vmem>>, vector<8x16xf32>
    %cst_30 = arith.constant dense<0.000000e+00> : vector<16x16xf32>
    %23 = tpu.matmul %21, %22, %cst_30 {dimension_numbers = #tpu.dot_dimension_numbers<[1], [0], [0], [1], [0, 0, 1, 1], [], []>} : vector<16x8xf32>, vector<8x16xf32>, vector<16x16xf32> -> vector<16x16xf32>
    %c0_31 = arith.constant 0 : index
    %c1_32 = arith.constant 1 : index
    %c0_33 = arith.constant 0 : index
    %c0_34 = arith.constant 0 : index
    %24 = vector.load %arg11[%c0_31, %c1_32, %c0_33, %c0_34] : memref<1x3x16x16xf32, #tpu.memory_space<vmem>>, vector<1x1x16x16xf32>
    %25 = vector.shape_cast %24 : vector<1x1x16x16xf32> to vector<16x16xf32>
    %26 = vector.shape_cast %23 : vector<16x16xf32> to vector<1x1x16x16xf32>
    tpu.vector_store %arg11[%c0_31, %c1_32, %c0_33, %c0_34], %26 {strides = array<i32>} : memref<1x3x16x16xf32, #tpu.memory_space<vmem>>, vector<1x1x16x16xf32>,
    %c0_35 = arith.constant 0 : index
    %c0_36 = arith.constant 0 : index
    %27 = vector.load %arg5[%c0_35, %c0_36] : memref<16x8xf32, #tpu.memory_space<vmem>>, vector<16x8xf32>
    %c0_37 = arith.constant 0 : index
    %c2 = arith.constant 2 : index
    %c0_38 = arith.constant 0 : index
    %c0_39 = arith.constant 0 : index
    %28 = vector.load %arg4[%c0_37, %c2, %c0_38, %c0_39] : memref<1x3x8x8xf32, #tpu.memory_space<vmem>>, vector<1x1x8x8xf32>
    %29 = vector.shape_cast %28 : vector<1x1x8x8xf32> to vector<8x8xf32>
    %cst_40 = arith.constant dense<0.000000e+00> : vector<16x8xf32>
    %30 = tpu.matmul %27, %29, %cst_40 {dimension_numbers = #tpu.dot_dimension_numbers<[1], [0], [0], [1], [0, 0, 1, 1], [], []>} : vector<16x8xf32>, vector<8x8xf32>, vector<16x8xf32> -> vector<16x8xf32>
    %c0_41 = arith.constant 0 : index
    %c0_42 = arith.constant 0 : index
    %31 = vector.load %arg6[%c0_41, %c0_42] : memref<8x16xf32, #tpu.memory_space<vmem>>, vector<8x16xf32>
    %cst_43 = arith.constant dense<0.000000e+00> : vector<16x16xf32>
    %32 = tpu.matmul %30, %31, %cst_43 {dimension_numbers = #tpu.dot_dimension_numbers<[1], [0], [0], [1], [0, 0, 1, 1], [], []>} : vector<16x8xf32>, vector<8x16xf32>, vector<16x16xf32> -> vector<16x16xf32>
    %c0_44 = arith.constant 0 : index
    %c2_45 = arith.constant 2 : index
    %c0_46 = arith.constant 0 : index
    %c0_47 = arith.constant 0 : index
    %33 = vector.load %arg11[%c0_44, %c2_45, %c0_46, %c0_47] : memref<1x3x16x16xf32, #tpu.memory_space<vmem>>, vector<1x1x16x16xf32>
    %34 = vector.shape_cast %33 : vector<1x1x16x16xf32> to vector<16x16xf32>
    %35 = vector.shape_cast %32 : vector<16x16xf32> to vector<1x1x16x16xf32>
    tpu.vector_store %arg11[%c0_44, %c2_45, %c0_46, %c0_47], %35 {strides = array<i32>} : memref<1x3x16x16xf32, #tpu.memory_space<vmem>>, vector<1x1x16x16xf32>,
    %c0_48 = arith.constant 0 : index
    %c0_49 = arith.constant 0 : index
    %c0_50 = arith.constant 0 : index
    %c0_51 = arith.constant 0 : index
    %36 = vector.load %arg3[%c0_48, %c0_49, %c0_50, %c0_51] : memref<1x4x16x16xf32, #tpu.memory_space<vmem>>, vector<1x4x1x16xf32>
    %37 = vector.shape_cast %36 : vector<1x4x1x16xf32> to vector<4x16xf32>
    %cst_52 = arith.constant dense<0.000000e+00> : vector<3x16xf32>
    %38 = tpu.matmul %8, %37, %cst_52 {dimension_numbers = #tpu.dot_dimension_numbers<[1], [0], [0], [1], [0, 0, 1, 1], [], []>} : vector<3x4xf32>, vector<4x16xf32>, vector<3x16xf32> -> vector<3x16xf32>
    %c0_53 = arith.constant 0 : index
    %c0_54 = arith.constant 0 : index
    %c0_55 = arith.constant 0 : index
    %c0_56 = arith.constant 0 : index
    %39 = vector.load %arg11[%c0_53, %c0_54, %c0_55, %c0_56] : memref<1x3x16x16xf32, #tpu.memory_space<vmem>>, vector<1x3x1x16xf32>
    %40 = vector.shape_cast %39 : vector<1x3x1x16xf32> to vector<3x16xf32>
    %41 = arith.addf %40, %38 : vector<3x16xf32>
    %c0_57 = arith.constant 0 : index
    %c0_58 = arith.constant 0 : index
    %42 = vector.load %arg10[%c0_57, %c0_58] : memref<3x1xf32, #tpu.memory_space<vmem>>, vector<3x1xf32>
    %43 = vector.broadcast %42 : vector<3x1xf32> to vector<3x16xf32>
    %44 = arith.addf %41, %43 : vector<3x16xf32>
    %c0_59 = arith.constant 0 : index
    %c0_60 = arith.constant 0 : index
    %c0_61 = arith.constant 0 : index
    %c0_62 = arith.constant 0 : index
    %45 = vector.load %arg11[%c0_59, %c0_60, %c0_61, %c0_62] : memref<1x3x16x16xf32, #tpu.memory_space<vmem>>, vector<1x3x1x16xf32>
    %46 = vector.shape_cast %45 : vector<1x3x1x16xf32> to vector<3x16xf32>
    %47 = vector.shape_cast %44 : vector<3x16xf32> to vector<1x3x1x16xf32>
    tpu.vector_store %arg11[%c0_59, %c0_60, %c0_61, %c0_62], %47 {strides = array<i32>} : memref<1x3x16x16xf32, #tpu.memory_space<vmem>>, vector<1x3x1x16xf32>,
    %c0_63 = arith.constant 0 : index
    %c0_64 = arith.constant 0 : index
    %c1_65 = arith.constant 1 : index
    %c0_66 = arith.constant 0 : index
    %48 = vector.load %arg3[%c0_63, %c0_64, %c1_65, %c0_66] : memref<1x4x16x16xf32, #tpu.memory_space<vmem>>, vector<1x4x1x16xf32>
    %49 = vector.shape_cast %48 : vector<1x4x1x16xf32> to vector<4x16xf32>
    %cst_67 = arith.constant dense<0.000000e+00> : vector<3x16xf32>
    %50 = tpu.matmul %8, %49, %cst_67 {dimension_numbers = #tpu.dot_dimension_numbers<[1], [0], [0], [1], [0, 0, 1, 1], [], []>} : vector<3x4xf32>, vector<4x16xf32>, vector<3x16xf32> -> vector<3x16xf32>
    %c0_68 = arith.constant 0 : index
    %c0_69 = arith.constant 0 : index
    %c1_70 = arith.constant 1 : index
    %c0_71 = arith.constant 0 : index
    %51 = vector.load %arg11[%c0_68, %c0_69, %c1_70, %c0_71] : memref<1x3x16x16xf32, #tpu.memory_space<vmem>>, vector<1x3x1x16xf32>
    %52 = vector.shape_cast %51 : vector<1x3x1x16xf32> to vector<3x16xf32>
    %53 = arith.addf %52, %50 : vector<3x16xf32>
    %c0_72 = arith.constant 0 : index
    %c0_73 = arith.constant 0 : index
    %54 = vector.load %arg10[%c0_72, %c0_73] : memref<3x1xf32, #tpu.memory_space<vmem>>, vector<3x1xf32>
    %55 = vector.broadcast %54 : vector<3x1xf32> to vector<3x16xf32>
    %56 = arith.addf %53, %55 : vector<3x16xf32>
    %c0_74 = arith.constant 0 : index
    %c0_75 = arith.constant 0 : index
    %c1_76 = arith.constant 1 : index
    %c0_77 = arith.constant 0 : index
    %57 = vector.load %arg11[%c0_74, %c0_75, %c1_76, %c0_77] : memref<1x3x16x16xf32, #tpu.memory_space<vmem>>, vector<1x3x1x16xf32>
    %58 = vector.shape_cast %57 : vector<1x3x1x16xf32> to vector<3x16xf32>
    %59 = vector.shape_cast %56 : vector<3x16xf32> to vector<1x3x1x16xf32>
    tpu.vector_store %arg11[%c0_74, %c0_75, %c1_76, %c0_77], %59 {strides = array<i32>} : memref<1x3x16x16xf32, #tpu.memory_space<vmem>>, vector<1x3x1x16xf32>,
    %c0_78 = arith.constant 0 : index
    %c0_79 = arith.constant 0 : index
    %c2_80 = arith.constant 2 : index
    %c0_81 = arith.constant 0 : index
    %60 = vector.load %arg3[%c0_78, %c0_79, %c2_80, %c0_81] : memref<1x4x16x16xf32, #tpu.memory_space<vmem>>, vector<1x4x1x16xf32>
    %61 = vector.shape_cast %60 : vector<1x4x1x16xf32> to vector<4x16xf32>
    %cst_82 = arith.constant dense<0.000000e+00> : vector<3x16xf32>
    %62 = tpu.matmul %8, %61, %cst_82 {dimension_numbers = #tpu.dot_dimension_numbers<[1], [0], [0], [1], [0, 0, 1, 1], [], []>} : vector<3x4xf32>, vector<4x16xf32>, vector<3x16xf32> -> vector<3x16xf32>
    %c0_83 = arith.constant 0 : index
    %c0_84 = arith.constant 0 : index
    %c2_85 = arith.constant 2 : index
    %c0_86 = arith.constant 0 : index
    %63 = vector.load %arg11[%c0_83, %c0_84, %c2_85, %c0_86] : memref<1x3x16x16xf32, #tpu.memory_space<vmem>>, vector<1x3x1x16xf32>
    %64 = vector.shape_cast %63 : vector<1x3x1x16xf32> to vector<3x16xf32>
    %65 = arith.addf %64, %62 : vector<3x16xf32>
    %c0_87 = arith.constant 0 : index
    %c0_88 = arith.constant 0 : index
    %66 = vector.load %arg10[%c0_87, %c0_88] : memref<3x1xf32, #tpu.memory_space<vmem>>, vector<3x1xf32>
    %67 = vector.broadcast %66 : vector<3x1xf32> to vector<3x16xf32>
    %68 = arith.addf %65, %67 : vector<3x16xf32>
    %c0_89 = arith.constant 0 : index
    %c0_90 = arith.constant 0 : index
    %c2_91 = arith.constant 2 : index
    %c0_92 = arith.constant 0 : index
    %69 = vector.load %arg11[%c0_89, %c0_90, %c2_91, %c0_92] : memref<1x3x16x16xf32, #tpu.memory_space<vmem>>, vector<1x3x1x16xf32>
    %70 = vector.shape_cast %69 : vector<1x3x1x16xf32> to vector<3x16xf32>
    %71 = vector.shape_cast %68 : vector<3x16xf32> to vector<1x3x1x16xf32>
    tpu.vector_store %arg11[%c0_89, %c0_90, %c2_91, %c0_92], %71 {strides = array<i32>} : memref<1x3x16x16xf32, #tpu.memory_space<vmem>>, vector<1x3x1x16xf32>,
    %c0_93 = arith.constant 0 : index
    %c0_94 = arith.constant 0 : index
    %c3 = arith.constant 3 : index
    %c0_95 = arith.constant 0 : index
    %72 = vector.load %arg3[%c0_93, %c0_94, %c3, %c0_95] : memref<1x4x16x16xf32, #tpu.memory_space<vmem>>, vector<1x4x1x16xf32>
    %73 = vector.shape_cast %72 : vector<1x4x1x16xf32> to vector<4x16xf32>
    %cst_96 = arith.constant dense<0.000000e+00> : vector<3x16xf32>
    %74 = tpu.matmul %8, %73, %cst_96 {dimension_numbers = #tpu.dot_dimension_numbers<[1], [0], [0], [1], [0, 0, 1, 1], [], []>} : vector<3x4xf32>, vector<4x16xf32>, vector<3x16xf32> -> vector<3x16xf32>
    %c0_97 = arith.constant 0 : index
    %c0_98 = arith.constant 0 : index
    %c3_99 = arith.constant 3 : index
    %c0_100 = arith.constant 0 : index
    %75 = vector.load %arg11[%c0_97, %c0_98, %c3_99, %c0_100] : memref<1x3x16x16xf32, #tpu.memory_space<vmem>>, vector<1x3x1x16xf32>
    %76 = vector.shape_cast %75 : vector<1x3x1x16xf32> to vector<3x16xf32>
    %77 = arith.addf %76, %74 : vector<3x16xf32>
    %c0_101 = arith.constant 0 : index
    %c0_102 = arith.constant 0 : index
    %78 = vector.load %arg10[%c0_101, %c0_102] : memref<3x1xf32, #tpu.memory_space<vmem>>, vector<3x1xf32>
    %79 = vector.broadcast %78 : vector<3x1xf32> to vector<3x16xf32>
    %80 = arith.addf %77, %79 : vector<3x16xf32>
    %c0_103 = arith.constant 0 : index
    %c0_104 = arith.constant 0 : index
    %c3_105 = arith.constant 3 : index
    %c0_106 = arith.constant 0 : index
    %81 = vector.load %arg11[%c0_103, %c0_104, %c3_105, %c0_106] : memref<1x3x16x16xf32, #tpu.memory_space<vmem>>, vector<1x3x1x16xf32>
    %82 = vector.shape_cast %81 : vector<1x3x1x16xf32> to vector<3x16xf32>
    %83 = vector.shape_cast %80 : vector<3x16xf32> to vector<1x3x1x16xf32>
    tpu.vector_store %arg11[%c0_103, %c0_104, %c3_105, %c0_106], %83 {strides = array<i32>} : memref<1x3x16x16xf32, #tpu.memory_space<vmem>>, vector<1x3x1x16xf32>,
    %c0_107 = arith.constant 0 : index
    %c0_108 = arith.constant 0 : index
    %c4 = arith.constant 4 : index
    %c0_109 = arith.constant 0 : index
    %84 = vector.load %arg3[%c0_107, %c0_108, %c4, %c0_109] : memref<1x4x16x16xf32, #tpu.memory_space<vmem>>, vector<1x4x1x16xf32>
    %85 = vector.shape_cast %84 : vector<1x4x1x16xf32> to vector<4x16xf32>
    %cst_110 = arith.constant dense<0.000000e+00> : vector<3x16xf32>
    %86 = tpu.matmul %8, %85, %cst_110 {dimension_numbers = #tpu.dot_dimension_numbers<[1], [0], [0], [1], [0, 0, 1, 1], [], []>} : vector<3x4xf32>, vector<4x16xf32>, vector<3x16xf32> -> vector<3x16xf32>
    %c0_111 = arith.constant 0 : index
    %c0_112 = arith.constant 0 : index
    %c4_113 = arith.constant 4 : index
    %c0_114 = arith.constant 0 : index
    %87 = vector.load %arg11[%c0_111, %c0_112, %c4_113, %c0_114] : memref<1x3x16x16xf32, #tpu.memory_space<vmem>>, vector<1x3x1x16xf32>
    %88 = vector.shape_cast %87 : vector<1x3x1x16xf32> to vector<3x16xf32>
    %89 = arith.addf %88, %86 : vector<3x16xf32>
    %c0_115 = arith.constant 0 : index
    %c0_116 = arith.constant 0 : index
    %90 = vector.load %arg10[%c0_115, %c0_116] : memref<3x1xf32, #tpu.memory_space<vmem>>, vector<3x1xf32>
    %91 = vector.broadcast %90 : vector<3x1xf32> to vector<3x16xf32>
    %92 = arith.addf %89, %91 : vector<3x16xf32>
    %c0_117 = arith.constant 0 : index
    %c0_118 = arith.constant 0 : index
    %c4_119 = arith.constant 4 : index
    %c0_120 = arith.constant 0 : index
    %93 = vector.load %arg11[%c0_117, %c0_118, %c4_119, %c0_120] : memref<1x3x16x16xf32, #tpu.memory_space<vmem>>, vector<1x3x1x16xf32>
    %94 = vector.shape_cast %93 : vector<1x3x1x16xf32> to vector<3x16xf32>
    %95 = vector.shape_cast %92 : vector<3x16xf32> to vector<1x3x1x16xf32>
    tpu.vector_store %arg11[%c0_117, %c0_118, %c4_119, %c0_120], %95 {strides = array<i32>} : memref<1x3x16x16xf32, #tpu.memory_space<vmem>>, vector<1x3x1x16xf32>,
    %c0_121 = arith.constant 0 : index
    %c0_122 = arith.constant 0 : index
    %c5 = arith.constant 5 : index
    %c0_123 = arith.constant 0 : index
    %96 = vector.load %arg3[%c0_121, %c0_122, %c5, %c0_123] : memref<1x4x16x16xf32, #tpu.memory_space<vmem>>, vector<1x4x1x16xf32>
    %97 = vector.shape_cast %96 : vector<1x4x1x16xf32> to vector<4x16xf32>
    %cst_124 = arith.constant dense<0.000000e+00> : vector<3x16xf32>
    %98 = tpu.matmul %8, %97, %cst_124 {dimension_numbers = #tpu.dot_dimension_numbers<[1], [0], [0], [1], [0, 0, 1, 1], [], []>} : vector<3x4xf32>, vector<4x16xf32>, vector<3x16xf32> -> vector<3x16xf32>
    %c0_125 = arith.constant 0 : index
    %c0_126 = arith.constant 0 : index
    %c5_127 = arith.constant 5 : index
    %c0_128 = arith.constant 0 : index
    %99 = vector.load %arg11[%c0_125, %c0_126, %c5_127, %c0_128] : memref<1x3x16x16xf32, #tpu.memory_space<vmem>>, vector<1x3x1x16xf32>
    %100 = vector.shape_cast %99 : vector<1x3x1x16xf32> to vector<3x16xf32>
    %101 = arith.addf %100, %98 : vector<3x16xf32>
    %c0_129 = arith.constant 0 : index
    %c0_130 = arith.constant 0 : index
    %102 = vector.load %arg10[%c0_129, %c0_130] : memref<3x1xf32, #tpu.memory_space<vmem>>, vector<3x1xf32>
    %103 = vector.broadcast %102 : vector<3x1xf32> to vector<3x16xf32>
    %104 = arith.addf %101, %103 : vector<3x16xf32>
    %c0_131 = arith.constant 0 : index
    %c0_132 = arith.constant 0 : index
    %c5_133 = arith.constant 5 : index
    %c0_134 = arith.constant 0 : index
    %105 = vector.load %arg11[%c0_131, %c0_132, %c5_133, %c0_134] : memref<1x3x16x16xf32, #tpu.memory_space<vmem>>, vector<1x3x1x16xf32>
    %106 = vector.shape_cast %105 : vector<1x3x1x16xf32> to vector<3x16xf32>
    %107 = vector.shape_cast %104 : vector<3x16xf32> to vector<1x3x1x16xf32>
    tpu.vector_store %arg11[%c0_131, %c0_132, %c5_133, %c0_134], %107 {strides = array<i32>} : memref<1x3x16x16xf32, #tpu.memory_space<vmem>>, vector<1x3x1x16xf32>,
    %c0_135 = arith.constant 0 : index
    %c0_136 = arith.constant 0 : index
    %c6 = arith.constant 6 : index
    %c0_137 = arith.constant 0 : index
    %108 = vector.load %arg3[%c0_135, %c0_136, %c6, %c0_137] : memref<1x4x16x16xf32, #tpu.memory_space<vmem>>, vector<1x4x1x16xf32>
    %109 = vector.shape_cast %108 : vector<1x4x1x16xf32> to vector<4x16xf32>
    %cst_138 = arith.constant dense<0.000000e+00> : vector<3x16xf32>
    %110 = tpu.matmul %8, %109, %cst_138 {dimension_numbers = #tpu.dot_dimension_numbers<[1], [0], [0], [1], [0, 0, 1, 1], [], []>} : vector<3x4xf32>, vector<4x16xf32>, vector<3x16xf32> -> vector<3x16xf32>
    %c0_139 = arith.constant 0 : index
    %c0_140 = arith.constant 0 : index
    %c6_141 = arith.constant 6 : index
    %c0_142 = arith.constant 0 : index
    %111 = vector.load %arg11[%c0_139, %c0_140, %c6_141, %c0_142] : memref<1x3x16x16xf32, #tpu.memory_space<vmem>>, vector<1x3x1x16xf32>
    %112 = vector.shape_cast %111 : vector<1x3x1x16xf32> to vector<3x16xf32>
    %113 = arith.addf %112, %110 : vector<3x16xf32>
    %c0_143 = arith.constant 0 : index
    %c0_144 = arith.constant 0 : index
    %114 = vector.load %arg10[%c0_143, %c0_144] : memref<3x1xf32, #tpu.memory_space<vmem>>, vector<3x1xf32>
    %115 = vector.broadcast %114 : vector<3x1xf32> to vector<3x16xf32>
    %116 = arith.addf %113, %115 : vector<3x16xf32>
    %c0_145 = arith.constant 0 : index
    %c0_146 = arith.constant 0 : index
    %c6_147 = arith.constant 6 : index
    %c0_148 = arith.constant 0 : index
    %117 = vector.load %arg11[%c0_145, %c0_146, %c6_147, %c0_148] : memref<1x3x16x16xf32, #tpu.memory_space<vmem>>, vector<1x3x1x16xf32>
    %118 = vector.shape_cast %117 : vector<1x3x1x16xf32> to vector<3x16xf32>
    %119 = vector.shape_cast %116 : vector<3x16xf32> to vector<1x3x1x16xf32>
    tpu.vector_store %arg11[%c0_145, %c0_146, %c6_147, %c0_148], %119 {strides = array<i32>} : memref<1x3x16x16xf32, #tpu.memory_space<vmem>>, vector<1x3x1x16xf32>,
    %c0_149 = arith.constant 0 : index
    %c0_150 = arith.constant 0 : index
    %c7 = arith.constant 7 : index
    %c0_151 = arith.constant 0 : index
    %120 = vector.load %arg3[%c0_149, %c0_150, %c7, %c0_151] : memref<1x4x16x16xf32, #tpu.memory_space<vmem>>, vector<1x4x1x16xf32>
    %121 = vector.shape_cast %120 : vector<1x4x1x16xf32> to vector<4x16xf32>
    %cst_152 = arith.constant dense<0.000000e+00> : vector<3x16xf32>
    %122 = tpu.matmul %8, %121, %cst_152 {dimension_numbers = #tpu.dot_dimension_numbers<[1], [0], [0], [1], [0, 0, 1, 1], [], []>} : vector<3x4xf32>, vector<4x16xf32>, vector<3x16xf32> -> vector<3x16xf32>
    %c0_153 = arith.constant 0 : index
    %c0_154 = arith.constant 0 : index
    %c7_155 = arith.constant 7 : index
    %c0_156 = arith.constant 0 : index
    %123 = vector.load %arg11[%c0_153, %c0_154, %c7_155, %c0_156] : memref<1x3x16x16xf32, #tpu.memory_space<vmem>>, vector<1x3x1x16xf32>
    %124 = vector.shape_cast %123 : vector<1x3x1x16xf32> to vector<3x16xf32>
    %125 = arith.addf %124, %122 : vector<3x16xf32>
    %c0_157 = arith.constant 0 : index
    %c0_158 = arith.constant 0 : index
    %126 = vector.load %arg10[%c0_157, %c0_158] : memref<3x1xf32, #tpu.memory_space<vmem>>, vector<3x1xf32>
    %127 = vector.broadcast %126 : vector<3x1xf32> to vector<3x16xf32>
    %128 = arith.addf %125, %127 : vector<3x16xf32>
    %c0_159 = arith.constant 0 : index
    %c0_160 = arith.constant 0 : index
    %c7_161 = arith.constant 7 : index
    %c0_162 = arith.constant 0 : index
    %129 = vector.load %arg11[%c0_159, %c0_160, %c7_161, %c0_162] : memref<1x3x16x16xf32, #tpu.memory_space<vmem>>, vector<1x3x1x16xf32>
    %130 = vector.shape_cast %129 : vector<1x3x1x16xf32> to vector<3x16xf32>
    %131 = vector.shape_cast %128 : vector<3x16xf32> to vector<1x3x1x16xf32>
    tpu.vector_store %arg11[%c0_159, %c0_160, %c7_161, %c0_162], %131 {strides = array<i32>} : memref<1x3x16x16xf32, #tpu.memory_space<vmem>>, vector<1x3x1x16xf32>,
    %c0_163 = arith.constant 0 : index
    %c0_164 = arith.constant 0 : index
    %c8 = arith.constant 8 : index
    %c0_165 = arith.constant 0 : index
    %132 = vector.load %arg3[%c0_163, %c0_164, %c8, %c0_165] : memref<1x4x16x16xf32, #tpu.memory_space<vmem>>, vector<1x4x1x16xf32>
    %133 = vector.shape_cast %132 : vector<1x4x1x16xf32> to vector<4x16xf32>
    %cst_166 = arith.constant dense<0.000000e+00> : vector<3x16xf32>
    %134 = tpu.matmul %8, %133, %cst_166 {dimension_numbers = #tpu.dot_dimension_numbers<[1], [0], [0], [1], [0, 0, 1, 1], [], []>} : vector<3x4xf32>, vector<4x16xf32>, vector<3x16xf32> -> vector<3x16xf32>
    %c0_167 = arith.constant 0 : index
    %c0_168 = arith.constant 0 : index
    %c8_169 = arith.constant 8 : index
    %c0_170 = arith.constant 0 : index
    %135 = vector.load %arg11[%c0_167, %c0_168, %c8_169, %c0_170] : memref<1x3x16x16xf32, #tpu.memory_space<vmem>>, vector<1x3x1x16xf32>
    %136 = vector.shape_cast %135 : vector<1x3x1x16xf32> to vector<3x16xf32>
    %137 = arith.addf %136, %134 : vector<3x16xf32>
    %c0_171 = arith.constant 0 : index
    %c0_172 = arith.constant 0 : index
    %138 = vector.load %arg10[%c0_171, %c0_172] : memref<3x1xf32, #tpu.memory_space<vmem>>, vector<3x1xf32>
    %139 = vector.broadcast %138 : vector<3x1xf32> to vector<3x16xf32>
    %140 = arith.addf %137, %139 : vector<3x16xf32>
    %c0_173 = arith.constant 0 : index
    %c0_174 = arith.constant 0 : index
    %c8_175 = arith.constant 8 : index
    %c0_176 = arith.constant 0 : index
    %141 = vector.load %arg11[%c0_173, %c0_174, %c8_175, %c0_176] : memref<1x3x16x16xf32, #tpu.memory_space<vmem>>, vector<1x3x1x16xf32>
    %142 = vector.shape_cast %141 : vector<1x3x1x16xf32> to vector<3x16xf32>
    %143 = vector.shape_cast %140 : vector<3x16xf32> to vector<1x3x1x16xf32>
    tpu.vector_store %arg11[%c0_173, %c0_174, %c8_175, %c0_176], %143 {strides = array<i32>} : memref<1x3x16x16xf32, #tpu.memory_space<vmem>>, vector<1x3x1x16xf32>,
    %c0_177 = arith.constant 0 : index
    %c0_178 = arith.constant 0 : index
    %c9 = arith.constant 9 : index
    %c0_179 = arith.constant 0 : index
    %144 = vector.load %arg3[%c0_177, %c0_178, %c9, %c0_179] : memref<1x4x16x16xf32, #tpu.memory_space<vmem>>, vector<1x4x1x16xf32>
    %145 = vector.shape_cast %144 : vector<1x4x1x16xf32> to vector<4x16xf32>
    %cst_180 = arith.constant dense<0.000000e+00> : vector<3x16xf32>
    %146 = tpu.matmul %8, %145, %cst_180 {dimension_numbers = #tpu.dot_dimension_numbers<[1], [0], [0], [1], [0, 0, 1, 1], [], []>} : vector<3x4xf32>, vector<4x16xf32>, vector<3x16xf32> -> vector<3x16xf32>
    %c0_181 = arith.constant 0 : index
    %c0_182 = arith.constant 0 : index
    %c9_183 = arith.constant 9 : index
    %c0_184 = arith.constant 0 : index
    %147 = vector.load %arg11[%c0_181, %c0_182, %c9_183, %c0_184] : memref<1x3x16x16xf32, #tpu.memory_space<vmem>>, vector<1x3x1x16xf32>
    %148 = vector.shape_cast %147 : vector<1x3x1x16xf32> to vector<3x16xf32>
    %149 = arith.addf %148, %146 : vector<3x16xf32>
    %c0_185 = arith.constant 0 : index
    %c0_186 = arith.constant 0 : index
    %150 = vector.load %arg10[%c0_185, %c0_186] : memref<3x1xf32, #tpu.memory_space<vmem>>, vector<3x1xf32>
    %151 = vector.broadcast %150 : vector<3x1xf32> to vector<3x16xf32>
    %152 = arith.addf %149, %151 : vector<3x16xf32>
    %c0_187 = arith.constant 0 : index
    %c0_188 = arith.constant 0 : index
    %c9_189 = arith.constant 9 : index
    %c0_190 = arith.constant 0 : index
    %153 = vector.load %arg11[%c0_187, %c0_188, %c9_189, %c0_190] : memref<1x3x16x16xf32, #tpu.memory_space<vmem>>, vector<1x3x1x16xf32>
    %154 = vector.shape_cast %153 : vector<1x3x1x16xf32> to vector<3x16xf32>
    %155 = vector.shape_cast %152 : vector<3x16xf32> to vector<1x3x1x16xf32>
    tpu.vector_store %arg11[%c0_187, %c0_188, %c9_189, %c0_190], %155 {strides = array<i32>} : memref<1x3x16x16xf32, #tpu.memory_space<vmem>>, vector<1x3x1x16xf32>,
    %c0_191 = arith.constant 0 : index
    %c0_192 = arith.constant 0 : index
    %c10 = arith.constant 10 : index
    %c0_193 = arith.constant 0 : index
    %156 = vector.load %arg3[%c0_191, %c0_192, %c10, %c0_193] : memref<1x4x16x16xf32, #tpu.memory_space<vmem>>, vector<1x4x1x16xf32>
    %157 = vector.shape_cast %156 : vector<1x4x1x16xf32> to vector<4x16xf32>
    %cst_194 = arith.constant dense<0.000000e+00> : vector<3x16xf32>
    %158 = tpu.matmul %8, %157, %cst_194 {dimension_numbers = #tpu.dot_dimension_numbers<[1], [0], [0], [1], [0, 0, 1, 1], [], []>} : vector<3x4xf32>, vector<4x16xf32>, vector<3x16xf32> -> vector<3x16xf32>
    %c0_195 = arith.constant 0 : index
    %c0_196 = arith.constant 0 : index
    %c10_197 = arith.constant 10 : index
    %c0_198 = arith.constant 0 : index
    %159 = vector.load %arg11[%c0_195, %c0_196, %c10_197, %c0_198] : memref<1x3x16x16xf32, #tpu.memory_space<vmem>>, vector<1x3x1x16xf32>
    %160 = vector.shape_cast %159 : vector<1x3x1x16xf32> to vector<3x16xf32>
    %161 = arith.addf %160, %158 : vector<3x16xf32>
    %c0_199 = arith.constant 0 : index
    %c0_200 = arith.constant 0 : index
    %162 = vector.load %arg10[%c0_199, %c0_200] : memref<3x1xf32, #tpu.memory_space<vmem>>, vector<3x1xf32>
    %163 = vector.broadcast %162 : vector<3x1xf32> to vector<3x16xf32>
    %164 = arith.addf %161, %163 : vector<3x16xf32>
    %c0_201 = arith.constant 0 : index
    %c0_202 = arith.constant 0 : index
    %c10_203 = arith.constant 10 : index
    %c0_204 = arith.constant 0 : index
    %165 = vector.load %arg11[%c0_201, %c0_202, %c10_203, %c0_204] : memref<1x3x16x16xf32, #tpu.memory_space<vmem>>, vector<1x3x1x16xf32>
    %166 = vector.shape_cast %165 : vector<1x3x1x16xf32> to vector<3x16xf32>
    %167 = vector.shape_cast %164 : vector<3x16xf32> to vector<1x3x1x16xf32>
    tpu.vector_store %arg11[%c0_201, %c0_202, %c10_203, %c0_204], %167 {strides = array<i32>} : memref<1x3x16x16xf32, #tpu.memory_space<vmem>>, vector<1x3x1x16xf32>,
    %c0_205 = arith.constant 0 : index
    %c0_206 = arith.constant 0 : index
    %c11 = arith.constant 11 : index
    %c0_207 = arith.constant 0 : index
    %168 = vector.load %arg3[%c0_205, %c0_206, %c11, %c0_207] : memref<1x4x16x16xf32, #tpu.memory_space<vmem>>, vector<1x4x1x16xf32>
    %169 = vector.shape_cast %168 : vector<1x4x1x16xf32> to vector<4x16xf32>
    %cst_208 = arith.constant dense<0.000000e+00> : vector<3x16xf32>
    %170 = tpu.matmul %8, %169, %cst_208 {dimension_numbers = #tpu.dot_dimension_numbers<[1], [0], [0], [1], [0, 0, 1, 1], [], []>} : vector<3x4xf32>, vector<4x16xf32>, vector<3x16xf32> -> vector<3x16xf32>
    %c0_209 = arith.constant 0 : index
    %c0_210 = arith.constant 0 : index
    %c11_211 = arith.constant 11 : index
    %c0_212 = arith.constant 0 : index
    %171 = vector.load %arg11[%c0_209, %c0_210, %c11_211, %c0_212] : memref<1x3x16x16xf32, #tpu.memory_space<vmem>>, vector<1x3x1x16xf32>
    %172 = vector.shape_cast %171 : vector<1x3x1x16xf32> to vector<3x16xf32>
    %173 = arith.addf %172, %170 : vector<3x16xf32>
    %c0_213 = arith.constant 0 : index
    %c0_214 = arith.constant 0 : index
    %174 = vector.load %arg10[%c0_213, %c0_214] : memref<3x1xf32, #tpu.memory_space<vmem>>, vector<3x1xf32>
    %175 = vector.broadcast %174 : vector<3x1xf32> to vector<3x16xf32>
    %176 = arith.addf %173, %175 : vector<3x16xf32>
    %c0_215 = arith.constant 0 : index
    %c0_216 = arith.constant 0 : index
    %c11_217 = arith.constant 11 : index
    %c0_218 = arith.constant 0 : index
    %177 = vector.load %arg11[%c0_215, %c0_216, %c11_217, %c0_218] : memref<1x3x16x16xf32, #tpu.memory_space<vmem>>, vector<1x3x1x16xf32>
    %178 = vector.shape_cast %177 : vector<1x3x1x16xf32> to vector<3x16xf32>
    %179 = vector.shape_cast %176 : vector<3x16xf32> to vector<1x3x1x16xf32>
    tpu.vector_store %arg11[%c0_215, %c0_216, %c11_217, %c0_218], %179 {strides = array<i32>} : memref<1x3x16x16xf32, #tpu.memory_space<vmem>>, vector<1x3x1x16xf32>,
    %c0_219 = arith.constant 0 : index
    %c0_220 = arith.constant 0 : index
    %c12 = arith.constant 12 : index
    %c0_221 = arith.constant 0 : index
    %180 = vector.load %arg3[%c0_219, %c0_220, %c12, %c0_221] : memref<1x4x16x16xf32, #tpu.memory_space<vmem>>, vector<1x4x1x16xf32>
    %181 = vector.shape_cast %180 : vector<1x4x1x16xf32> to vector<4x16xf32>
    %cst_222 = arith.constant dense<0.000000e+00> : vector<3x16xf32>
    %182 = tpu.matmul %8, %181, %cst_222 {dimension_numbers = #tpu.dot_dimension_numbers<[1], [0], [0], [1], [0, 0, 1, 1], [], []>} : vector<3x4xf32>, vector<4x16xf32>, vector<3x16xf32> -> vector<3x16xf32>
    %c0_223 = arith.constant 0 : index
    %c0_224 = arith.constant 0 : index
    %c12_225 = arith.constant 12 : index
    %c0_226 = arith.constant 0 : index
    %183 = vector.load %arg11[%c0_223, %c0_224, %c12_225, %c0_226] : memref<1x3x16x16xf32, #tpu.memory_space<vmem>>, vector<1x3x1x16xf32>
    %184 = vector.shape_cast %183 : vector<1x3x1x16xf32> to vector<3x16xf32>
    %185 = arith.addf %184, %182 : vector<3x16xf32>
    %c0_227 = arith.constant 0 : index
    %c0_228 = arith.constant 0 : index
    %186 = vector.load %arg10[%c0_227, %c0_228] : memref<3x1xf32, #tpu.memory_space<vmem>>, vector<3x1xf32>
    %187 = vector.broadcast %186 : vector<3x1xf32> to vector<3x16xf32>
    %188 = arith.addf %185, %187 : vector<3x16xf32>
    %c0_229 = arith.constant 0 : index
    %c0_230 = arith.constant 0 : index
    %c12_231 = arith.constant 12 : index
    %c0_232 = arith.constant 0 : index
    %189 = vector.load %arg11[%c0_229, %c0_230, %c12_231, %c0_232] : memref<1x3x16x16xf32, #tpu.memory_space<vmem>>, vector<1x3x1x16xf32>
    %190 = vector.shape_cast %189 : vector<1x3x1x16xf32> to vector<3x16xf32>
    %191 = vector.shape_cast %188 : vector<3x16xf32> to vector<1x3x1x16xf32>
    tpu.vector_store %arg11[%c0_229, %c0_230, %c12_231, %c0_232], %191 {strides = array<i32>} : memref<1x3x16x16xf32, #tpu.memory_space<vmem>>, vector<1x3x1x16xf32>,
    %c0_233 = arith.constant 0 : index
    %c0_234 = arith.constant 0 : index
    %c13 = arith.constant 13 : index
    %c0_235 = arith.constant 0 : index
    %192 = vector.load %arg3[%c0_233, %c0_234, %c13, %c0_235] : memref<1x4x16x16xf32, #tpu.memory_space<vmem>>, vector<1x4x1x16xf32>
    %193 = vector.shape_cast %192 : vector<1x4x1x16xf32> to vector<4x16xf32>
    %cst_236 = arith.constant dense<0.000000e+00> : vector<3x16xf32>
    %194 = tpu.matmul %8, %193, %cst_236 {dimension_numbers = #tpu.dot_dimension_numbers<[1], [0], [0], [1], [0, 0, 1, 1], [], []>} : vector<3x4xf32>, vector<4x16xf32>, vector<3x16xf32> -> vector<3x16xf32>
    %c0_237 = arith.constant 0 : index
    %c0_238 = arith.constant 0 : index
    %c13_239 = arith.constant 13 : index
    %c0_240 = arith.constant 0 : index
    %195 = vector.load %arg11[%c0_237, %c0_238, %c13_239, %c0_240] : memref<1x3x16x16xf32, #tpu.memory_space<vmem>>, vector<1x3x1x16xf32>
    %196 = vector.shape_cast %195 : vector<1x3x1x16xf32> to vector<3x16xf32>
    %197 = arith.addf %196, %194 : vector<3x16xf32>
    %c0_241 = arith.constant 0 : index
    %c0_242 = arith.constant 0 : index
    %198 = vector.load %arg10[%c0_241, %c0_242] : memref<3x1xf32, #tpu.memory_space<vmem>>, vector<3x1xf32>
    %199 = vector.broadcast %198 : vector<3x1xf32> to vector<3x16xf32>
    %200 = arith.addf %197, %199 : vector<3x16xf32>
    %c0_243 = arith.constant 0 : index
    %c0_244 = arith.constant 0 : index
    %c13_245 = arith.constant 13 : index
    %c0_246 = arith.constant 0 : index
    %201 = vector.load %arg11[%c0_243, %c0_244, %c13_245, %c0_246] : memref<1x3x16x16xf32, #tpu.memory_space<vmem>>, vector<1x3x1x16xf32>
    %202 = vector.shape_cast %201 : vector<1x3x1x16xf32> to vector<3x16xf32>
    %203 = vector.shape_cast %200 : vector<3x16xf32> to vector<1x3x1x16xf32>
    tpu.vector_store %arg11[%c0_243, %c0_244, %c13_245, %c0_246], %203 {strides = array<i32>} : memref<1x3x16x16xf32, #tpu.memory_space<vmem>>, vector<1x3x1x16xf32>,
    %c0_247 = arith.constant 0 : index
    %c0_248 = arith.constant 0 : index
    %c14 = arith.constant 14 : index
    %c0_249 = arith.constant 0 : index
    %204 = vector.load %arg3[%c0_247, %c0_248, %c14, %c0_249] : memref<1x4x16x16xf32, #tpu.memory_space<vmem>>, vector<1x4x1x16xf32>
    %205 = vector.shape_cast %204 : vector<1x4x1x16xf32> to vector<4x16xf32>
    %cst_250 = arith.constant dense<0.000000e+00> : vector<3x16xf32>
    %206 = tpu.matmul %8, %205, %cst_250 {dimension_numbers = #tpu.dot_dimension_numbers<[1], [0], [0], [1], [0, 0, 1, 1], [], []>} : vector<3x4xf32>, vector<4x16xf32>, vector<3x16xf32> -> vector<3x16xf32>
    %c0_251 = arith.constant 0 : index
    %c0_252 = arith.constant 0 : index
    %c14_253 = arith.constant 14 : index
    %c0_254 = arith.constant 0 : index
    %207 = vector.load %arg11[%c0_251, %c0_252, %c14_253, %c0_254] : memref<1x3x16x16xf32, #tpu.memory_space<vmem>>, vector<1x3x1x16xf32>
    %208 = vector.shape_cast %207 : vector<1x3x1x16xf32> to vector<3x16xf32>
    %209 = arith.addf %208, %206 : vector<3x16xf32>
    %c0_255 = arith.constant 0 : index
    %c0_256 = arith.constant 0 : index
    %210 = vector.load %arg10[%c0_255, %c0_256] : memref<3x1xf32, #tpu.memory_space<vmem>>, vector<3x1xf32>
    %211 = vector.broadcast %210 : vector<3x1xf32> to vector<3x16xf32>
    %212 = arith.addf %209, %211 : vector<3x16xf32>
    %c0_257 = arith.constant 0 : index
    %c0_258 = arith.constant 0 : index
    %c14_259 = arith.constant 14 : index
    %c0_260 = arith.constant 0 : index
    %213 = vector.load %arg11[%c0_257, %c0_258, %c14_259, %c0_260] : memref<1x3x16x16xf32, #tpu.memory_space<vmem>>, vector<1x3x1x16xf32>
    %214 = vector.shape_cast %213 : vector<1x3x1x16xf32> to vector<3x16xf32>
    %215 = vector.shape_cast %212 : vector<3x16xf32> to vector<1x3x1x16xf32>
    tpu.vector_store %arg11[%c0_257, %c0_258, %c14_259, %c0_260], %215 {strides = array<i32>} : memref<1x3x16x16xf32, #tpu.memory_space<vmem>>, vector<1x3x1x16xf32>,
    %c0_261 = arith.constant 0 : index
    %c0_262 = arith.constant 0 : index
    %c15 = arith.constant 15 : index
    %c0_263 = arith.constant 0 : index
    %216 = vector.load %arg3[%c0_261, %c0_262, %c15, %c0_263] : memref<1x4x16x16xf32, #tpu.memory_space<vmem>>, vector<1x4x1x16xf32>
    %217 = vector.shape_cast %216 : vector<1x4x1x16xf32> to vector<4x16xf32>
    %cst_264 = arith.constant dense<0.000000e+00> : vector<3x16xf32>
    %218 = tpu.matmul %8, %217, %cst_264 {dimension_numbers = #tpu.dot_dimension_numbers<[1], [0], [0], [1], [0, 0, 1, 1], [], []>} : vector<3x4xf32>, vector<4x16xf32>, vector<3x16xf32> -> vector<3x16xf32>
    %c0_265 = arith.constant 0 : index
    %c0_266 = arith.constant 0 : index
    %c15_267 = arith.constant 15 : index
    %c0_268 = arith.constant 0 : index
    %219 = vector.load %arg11[%c0_265, %c0_266, %c15_267, %c0_268] : memref<1x3x16x16xf32, #tpu.memory_space<vmem>>, vector<1x3x1x16xf32>
    %220 = vector.shape_cast %219 : vector<1x3x1x16xf32> to vector<3x16xf32>
    %221 = arith.addf %220, %218 : vector<3x16xf32>
    %c0_269 = arith.constant 0 : index
    %c0_270 = arith.constant 0 : index
    %222 = vector.load %arg10[%c0_269, %c0_270] : memref<3x1xf32, #tpu.memory_space<vmem>>, vector<3x1xf32>
    %223 = vector.broadcast %222 : vector<3x1xf32> to vector<3x16xf32>
    %224 = arith.addf %221, %223 : vector<3x16xf32>
    %c0_271 = arith.constant 0 : index
    %c0_272 = arith.constant 0 : index
    %c15_273 = arith.constant 15 : index
    %c0_274 = arith.constant 0 : index
    %225 = vector.load %arg11[%c0_271, %c0_272, %c15_273, %c0_274] : memref<1x3x16x16xf32, #tpu.memory_space<vmem>>, vector<1x3x1x16xf32>
    %226 = vector.shape_cast %225 : vector<1x3x1x16xf32> to vector<3x16xf32>
    %227 = vector.shape_cast %224 : vector<3x16xf32> to vector<1x3x1x16xf32>
    tpu.vector_store %arg11[%c0_271, %c0_272, %c15_273, %c0_274], %227 {strides = array<i32>} : memref<1x3x16x16xf32, #tpu.memory_space<vmem>>, vector<1x3x1x16xf32>,
    return
  }
  func.func @transform_0(%arg0: i32, %arg1: i32) -> (i32, i32, i32) {
    %c0_i32 = arith.constant 0 : i32
    %c0_i32_0 = arith.constant 0 : i32
    %c0_i32_1 = arith.constant 0 : i32
    return %arg0, %c0_i32, %c0_i32_0 : i32, i32, i32
  }
  func.func @transform_1(%arg0: i32, %arg1: i32) -> (i32, i32, i32, i32) {
    %c0_i32 = arith.constant 0 : i32
    %c0_i32_0 = arith.constant 0 : i32
    %c0_i32_1 = arith.constant 0 : i32
    return %arg0, %c0_i32, %arg1, %c0_i32_0 : i32, i32, i32, i32
  }
  func.func @transform_2(%arg0: i32, %arg1: i32) -> (i32, i32, i32, i32) {
    %c0_i32 = arith.constant 0 : i32
    %c0_i32_0 = arith.constant 0 : i32
    %c0_i32_1 = arith.constant 0 : i32
    %c0_i32_2 = arith.constant 0 : i32
    return %arg0, %c0_i32, %c0_i32_0, %c0_i32_1 : i32, i32, i32, i32
  }
  func.func @transform_3(%arg0: i32, %arg1: i32) -> (i32, i32) {
    %c0_i32 = arith.constant 0 : i32
    %c0_i32_0 = arith.constant 0 : i32
    return %arg1, %c0_i32 : i32, i32
  }
  func.func @transform_4(%arg0: i32, %arg1: i32) -> (i32, i32) {
    %c0_i32 = arith.constant 0 : i32
    %c0_i32_0 = arith.constant 0 : i32
    %c0_i32_1 = arith.constant 0 : i32
    return %c0_i32, %c0_i32_0 : i32, i32
  }
  func.func @transform_5(%arg0: i32, %arg1: i32) -> (i32, i32) {
    %c0_i32 = arith.constant 0 : i32
    %c0_i32_0 = arith.constant 0 : i32
    %c0_i32_1 = arith.constant 0 : i32
    return %c0_i32, %c0_i32_0 : i32, i32
  }
  func.func @transform_6(%arg0: i32, %arg1: i32) -> (i32, i32) {
    %c0_i32 = arith.constant 0 : i32
    %c0_i32_0 = arith.constant 0 : i32
    %c0_i32_1 = arith.constant 0 : i32
    return %c0_i32, %c0_i32_0 : i32, i32
  }
  func.func @transform_7(%arg0: i32, %arg1: i32) -> (i32, i32) {
    %c0_i32 = arith.constant 0 : i32
    %c0_i32_0 = arith.constant 0 : i32
    %c0_i32_1 = arith.constant 0 : i32
    return %c0_i32, %c0_i32_0 : i32, i32
  }
  func.func @transform_8(%arg0: i32, %arg1: i32) -> (i32, i32) {
    %c0_i32 = arith.constant 0 : i32
    %c0_i32_0 = arith.constant 0 : i32
    %c0_i32_1 = arith.constant 0 : i32
    return %c0_i32, %c0_i32_0 : i32, i32
  }
  func.func @transform_9(%arg0: i32, %arg1: i32) -> (i32, i32, i32, i32) {
    %c0_i32 = arith.constant 0 : i32
    %c0_i32_0 = arith.constant 0 : i32
    %c0_i32_1 = arith.constant 0 : i32
    return %arg0, %c0_i32, %arg1, %c0_i32_0 : i32, i32, i32, i32
  }
}

</mosaic_0001>

<bundles_post_ra>
// kernel: tpu_custom_call.1
= control target key start
LH: loop header
LB: loop body
LE: loop exit
PB: predicated region body
PF: predicated region fallthrough
CT: control target
= control target key end

     0   :  { %s2870_s0 = inlined_call_operand.vmem [shape: f32[2,1,8], index: 0, kind: input, shape index: {}]   ;;  %s2871_s1 = inlined_call_operand.hbm [shape: f32[2,4,16,16], index: 1, kind: input, shape index: {}]   ;;  %s2872_s2 = inlined_call_operand.hbm [shape: f32[2,3,8,8], index: 2, kind: input, shape index: {}]   ;;  %s2873_s3 = inlined_call_operand.vmem [shape: f32[16,8], index: 3, kind: input, shape index: {}]   ;;  %s2874_s4 = inlined_call_operand.vmem [shape: f32[8,16], index: 4, kind: input, shape index: {}]   ;;  %s2875_s5 = inlined_call_operand.vmem [shape: f32[8,4], index: 5, kind: input, shape index: {}]   ;;  %s2876_s6 = inlined_call_operand.vmem [shape: f32[1,4], index: 6, kind: input, shape index: {}]   ;;  %s2877_s7 = inlined_call_operand.vmem [shape: f32[3,4], index: 7, kind: input, shape index: {}]   ;;  %s2878_s8 = inlined_call_operand.vmem [shape: f32[3,1], index: 8, kind: input, shape index: {}]   ;;  %s2879_s9 = inlined_call_operand.hbm [shape: f32[2,3,16,16], index: 9, kind: output, shape index: {}]  }
   0x1   :  { %2885 = sst [smem:[#allocation17_spill]] %s2871_s1 }
   0x2   :  { %14 = vsyncpa [#allocation3], 0 }
   0x3   :  { %16 = vsyncpa [#allocation3 + $0x1], 0 }
   0x4   :  { %17 = vsyncpa [#allocation6], 0 }
   0x5   :  { %19 = vsyncpa [#allocation6 + $0x1], 0 }
   0x6   :  { %20 = vsyncpa [#allocation4], 0 }
   0x7   :  { %22 = vsyncpa [#allocation4 + $0x1], 0  ;;  %s2212_s30 = smov 0   ;;  %s2214_s10 = smov 0  }
   0x8   :  { %s2216_s11 = smov 0   ;;  %s2218_s12 = smov 0  }
   0x9   :  { %s2220_s13 = smov 0   ;;  %s2222_s14 = smov 0  }
   0xa LB: > { %2886 = sst [smem:[#allocation11_spill]] %s2135_s30  ;;  %s1863_s15 = sadd.s32 4294967295, %s2155_s14   ;;  %s2155_s14 = sphi %s2222_s14, %s28_s14   ;;  %s2151_s13 = sphi %s2220_s13, %s2903_s13   ;;  %s2147_s12 = sphi %s2218_s12, %s2902_s12   ;;  %s2143_s11 = sphi %s2216_s11, %s2901_s11   ;;  %s2139_s10 = sphi %s2214_s10, %s2905_s10   ;;  %s2135_s30 = sphi %s2212_s30, %s2904_s30  }
   0xb   : > { %2887 = sst [smem:[#allocation12_spill]] %s2143_s11  ;;  %s1864_s16 = sadd.s32 4294967294, %s2155_s14  }
   0xc   : > { %2888 = sst [smem:[#allocation13_spill]] %s2151_s13  ;;  %s40_s17 = sadd.s32 1, %s2151_s13 }
   0xd   : > { %s75_s18 = sadd.s32 1, %s2143_s11  ;;  %p42_p0 = scmp.ge.s32.totalorder %s40_s17, 2 }
   0xe   : > { %p82_p1 = scmp.ne.s32.totalorder %s2143_s11, %s2139_s10  ;;  %p83_p2 = scmp.eq.s32.totalorder %s2155_s14, 0 }
   0xf   : > { %p88_p3 = scmp.ne.s32.totalorder %s2139_s10, %s2135_s30  ;;  %s2907_s17 = smov (%p42_p0, %s40_s17), 0 }
  0x10   : > { %2889 = sst [smem:[#allocation14_spill]] %s2907_s17  ;;  %p2253_p4 = por %p83_p2, %p82_p1 }
  0x11   : > { %p89_p5 = scmp.eq.s32.totalorder %s1863_s15, 0  ;;  %s70_s20 = ssub.s32 %s2151_s13, %s2907_s17 }
  0x12   : > { %p271_p6 = scmp.eq.s32.totalorder %s1863_s15, 1  ;;  %p73_p7 = scmp.eq.s32.totalorder %s70_s20, 0 }
  0x13   : > { %p2259_p8 = por %p89_p5, %p88_p3  ;;  %p277_p10 = scmp.eq.s32.totalorder %s1864_s16, 1 }
  0x14   : > { %p2263_p9 = por %p271_p6, %p82_p1  ;;  %p1867_p12 = scmp.ge.s32.totalorder %s2155_s14, 2 }
  0x15   : > { %s2268_s23 = scalar_select %p73_p7, %s2143_s11, %s75_s18  }
  0x16   : > { %p2270_p11 = por %p277_p10, %p88_p3  ;;  %p1951_p13 = scmp.lt.s32.totalorder %s2155_s14, 2 }
  0x17   : > { %2893 = sst [smem:[#allocation15_spill]] %s2268_s23  ;;  %s2277_s25 = sand.u32 1, %s2143_s11  }
  0x18   : > { %s2894_s24 = scalar_select %p2270_p11, 1, 0 }
  0x19   : > { %s1868_s26 = sshll.u32 %s2277_s25, 6  ;;  %s1928_s27 = sshll.u32 %s2151_s13, 6 }
  0x1a   : > { %2895 = sst [smem:[#allocation16_spill]] %s2894_s24  ;;  %s331_s16 = scalar_lea.vmem [#allocation2], %s1868_s26 }
  0x1b   : > { %s2896_s1 = sld [smem:[#allocation17_spill]]  ;;  %s341_s18 = sshll.u32 %s331_s16, 4  ;;  %s342_s18 = int_to_ptr.vmem [resolvable:$true] %s341_s18 }
  0x1c   : > { %p2286_p0 = pnand %p1951_p13, %p2253_p4  ;;  %p1872_p1 = scmp.ge.s32.totalorder %s2155_s14, 1 }
  0x1d   : > { %s328_s23 = scalar_lea.sflag [#allocation3], %s2277_s25  ;;  %s2157_s11 = smov 128  }
  0x1e   : > { %s2158_s24 = smov 8   ;;  %p371_p2 = scmp.lt.s32.totalorder %s2155_s14, 3 }
  0x1f   : > { %s1929_s26 = smul.u32 24, %s2277_s25  ;;  %s352_s30 = scalar_lea.sflag [#allocation6], %s2277_s25 }
  0x20   : > { %p372_p3 = pnand %p1872_p1, %p371_p2 }
  0x21   : > { %s338_s15 = scalar_lea.hbm %s2896_s1, %s1928_s27  ;;  %s1930_s27 = smul.u32 24, %s2151_s13 }
  0x22   : > { %s339_s20 = sshll.u32 %s338_s15, 4  ;;  %s355_s15 = scalar_lea.vmem [#allocation5], %s1929_s26  ;;  %s340_s20 = int_to_ptr.hbm [resolvable:$true] %s339_s20 }
  0x23   : > { %1943 = dma.hbm_to_vmem [thread:$0]  (!%p2286_p0), %s340_s20, 1024, %s342_s18, %s328_s23, %s2157_s11, %s2157_s11, %s2158_s24  }
  0x24   : > { %s360_s19 = scalar_lea.hbm %s2872_s2, %s1930_s27  ;;  %s363_s16 = sshll.u32 %s355_s15, 4  ;;  %s364_s16 = int_to_ptr.vmem [resolvable:$true] %s363_s16 }
  0x25   : > { %s361_s1 = sshll.u32 %s360_s19, 4  ;;  %375 = sbr.rel (%p372_p3) target bundleno = 379 (0x17b), region = 56  ;;  %s362_s1 = int_to_ptr.hbm [resolvable:$true] %s361_s1 }
  0x26   : > { %1946 = dma.hbm_to_vmem [thread:$0]  (!%p2286_p0), %s362_s1, 384, %s364_s16, %s352_s30, %s2157_s11, %s2157_s11, %s2158_s24  }
  0x27   : > { %s2304_s23 = sand.u32 (!%p372_p3), 1, %s2139_s10  }
  0x28   : > { %s1873_s18 = sshll.u32 (!%p372_p3), %s2304_s23, 6  ;;  %s378_s20 = scalar_lea.sflag (!%p372_p3), [#allocation3], %s2304_s23 }
  0x29   : > { %s2308_s13 = scalar_lea.vmem (!%p372_p3), [#allocation2], %s1873_s18 }
  0x2a   : > { %2122 = dma.done.wait (%p2259_p8), %s378_s20, 1024  }
  0x2b   : > { %2124 = vsyncadd (%p2259_p8), %s378_s20, 4294966272  ;;  %s1931_s1 = smul.u32 24, %s2304_s23  ;;  %s388_s30 = scalar_lea.sflag [#allocation6], %s2304_s23 }
  0x2d   : > { %s391_s11 = scalar_lea.vmem [#allocation5], %s1931_s1 }
  0x2e   : > { %2126 = dma.done.wait (%p2259_p8), %s388_s30, 384  }
  0x2f   : > { %2128 = vsyncadd (%p2259_p8), %s388_s30, 4294966912  ;;  %p440_p4 = scmp.lt.s32.totalorder %s2147_s12, 1  ;;  %v2159_v0 = vmov 0   ;;  %vm454_vm0 = vcmask 64512   ;;  %v452_v1 = vld [vmem:[%s2875_s5] sm:$0xff]  ;;  %v1886_v6 = vld [vmem:[%s391_s11 + $0x10] sm:$0xff] }
  0x30   : > { %2006 = vset.pattern.permute.xlu0 %v2159_v0  ;;  %2007 = vset.pattern.permute.xlu1 %v2159_v0  ;;  %v483_v2 = vld [vmem:[%s391_s11] sm:$0xff]  ;;  %v1879_v3 = vld [vmem:[%s391_s11 + $0x8] sm:$0xff]  ;;  %v679_v11 = vld [vmem:[%s2308_s13 + $0x10] sm:$0x1]  ;;  %vm687_vm1 = vcmask 1041409   ;;  %vm690_vm2 = vcmask 1042434  }
  0x31   : > { %s441_s17 = scalar_select %p440_p4, %s2147_s12, 1  ;;  %2008 = vset.pattern.permute.xlu2 %v2159_v0  ;;  %473 = vmatpush.msra.mxu0 %v452_v1  ;;  %v481_v5 = vld [vmem:[%s2873_s3] sm:$0xff]  ;;  %v482_v9 = vld [vmem:[%s2873_s3 + $0x8] sm:$0xff]  ;;  %v944_v12 = vld [vmem:[%s2308_s13 + $0x14] sm:$0x1]  ;;  %v686_v14 = vrot.slane %v679_v11, 7 }
  0x32   : > { %505 = vmatpush.msra.mxu1 %v483_v2  ;;  %571 = vmatpush.msra.mxu3 %v1879_v3  ;;  %v734_v7 = vld [vmem:[%s2878_s8] sm:$0x7]  ;;  %v945_v15 = vld [vmem:[%s2308_s13 + $0x24] sm:$0x1]  ;;  %v951_v16 = vrot.slane %v944_v12, 7  ;;  %vm693_vm3 = vcmask 1043459  }
  0x33   : > { %s442_s26 = scalar_lea.vmem %s2870_s0, %s441_s17  ;;  %1875 = vmatmul.msk.f32.vlgmr.msra.gmra.mxu1 %vm454_vm0, %v481_v5  ;;  %1880 = vmatmul.msk.f32.vlgmr.msra.gmra.mxu3 %vm454_vm0, %v481_v5  ;;  %v579_v8 = vld [vmem:[%s2874_s4] sm:$0xff]  ;;  %v681_v18 = vld [vmem:[%s2308_s13 + $0x30] sm:$0x1]  ;;  %vm699_vm4 = vcmask 1043456   ;;  %v946_v26 = vld [vmem:[%s2308_s13 + $0x34] sm:$0x1] }
  0x34   : > { %v451_v4 = vld [vmem:[%s442_s26] sm:$0x1]  ;;  %637 = vmatpush.msrb.mxu1 %v1886_v6  ;;  %737 = vperm.xlu0 %2006, %v734_v7   ;;  %v692_v21 = vrot.slane %v681_v18, 5  ;;  %v943_v25 = vld [vmem:[%s2308_s13 + $0x4] sm:$0x1]  ;;  %v953_v29 = vrot.slane %v945_v15, 6 }
  0x35   : > { %1874 = vmatmul.msk.f32.vlgmr.msra.gmra.mxu0 %vm454_vm0, %v451_v4  ;;  %535 = vmatpush.msra.mxu2 %v579_v8  ;;  %v799_v10 = vld [vmem:[%s2878_s8] sm:$0x7]  ;;  %v952_v28 = vsel %vm687_vm1, %v951_v16, %v943_v25  ;;  %v955_v30 = vrot.slane %v946_v26, 5  ;;  %v752_v33 = vld [vmem:[%s2308_s13 + $0x11] sm:$0x1]  ;;  %vm695_vm5 = vcmask 31744  }
  0x36   : > { %601 = vmatpush.msrb.mxu0 %v579_v8  ;;  %v680_v13 = vld [vmem:[%s2308_s13 + $0x20] sm:$0x1]  ;;  %v954_v31 = vsel %vm690_vm2, %v953_v29, %v952_v28  ;;  %v751_v32 = vld [vmem:[%s2308_s13 + $0x1] sm:$0x1]  ;;  %v754_v36 = vld [vmem:[%s2308_s13 + $0x31] sm:$0x1] }
  0x37   : > { %667 = vmatpush.msrb.mxu2 %v579_v8  ;;  %v678_v17 = vld [vmem:[%s2308_s13] sm:$0x1]  ;;  %v689_v19 = vrot.slane %v680_v13, 6  ;;  %v753_v34 = vld [vmem:[%s2308_s13 + $0x21] sm:$0x1]  ;;  %v956_v35 = vsel %vm693_vm3, %v955_v30, %v954_v31  ;;  %v759_v37 = vrot.slane %v752_v33, 7 }
  0x38   : > { %v688_v20 = vsel %vm687_vm1, %v686_v14, %v678_v17  ;;  %v863_v22 = vld [vmem:[%s2878_s8] sm:$0x7]  ;;  %v761_v38 = vrot.slane %v753_v34, 6  ;;  %v816_v39 = vld [vmem:[%s2308_s13 + $0x12] sm:$0x1]  ;;  %1901 = vmatpush.msk.msra.mxu1 %vm699_vm4, %v956_v35  ;;  %v763_v40 = vrot.slane %v754_v36, 5 }
  0x39   : > { %v1119_v23 = vld [vmem:[%s2878_s8] sm:$0x7]  ;;  %v691_v24 = vsel %vm690_vm2, %v689_v19, %v688_v20  ;;  %866 = vperm.xlu1 %2007, %v863_v22   ;;  %v823_v43 = vrot.slane %v816_v39, 7  ;;  %v760_v44 = vsel %vm687_vm1, %v759_v37, %v751_v32  ;;  %v818_v47 = vld [vmem:[%s2308_s13 + $0x32] sm:$0x1]  ;;  %vm543_vm6 = vcmask 130048  }
  0x3a   : > { %v694_v27 = vsel %vm693_vm3, %v692_v21, %v691_v24  ;;  %v927_v41 = vld [vmem:[%s2878_s8] sm:$0x7]  ;;  %v762_v48 = vsel %vm690_vm2, %v761_v38, %v760_v44  ;;  %v827_v51 = vrot.slane %v818_v47, 5  ;;  %v1199_v52 = vld [vmem:[%s2308_s13 + $0x8] sm:$0x1]  ;;  %vm747_vm7 = vcmask 122880  }
  0x3b   : > { %1876 = vmatmul.msk.f32.gmra.mxu1 %vm454_vm0, %v482_v9  ;;  %1881 = vmatmul.msk.f32.gmra.mxu3 %vm454_vm0, %v482_v9  ;;  %v1311_v42 = vld [vmem:[%s2878_s8] sm:$0x7]  ;;  %v1200_v53 = vld [vmem:[%s2308_s13 + $0x18] sm:$0x1]  ;;  %v764_v54 = vsel %vm693_vm3, %v763_v40, %v762_v48  ;;  %v1201_v55 = vld [vmem:[%s2308_s13 + $0x28] sm:$0x1] }
  0x3c   : > { %802 = vperm.xlu0 %2006, %v799_v10   ;;  %1893 = vmatpush.msk.msrb.mxu3 %vm699_vm4, %v694_v27  ;;  %v815_v45 = vld [vmem:[%s2308_s13 + $0x2] sm:$0x1]  ;;  %v1202_v56 = vld [vmem:[%s2308_s13 + $0x38] sm:$0x1]  ;;  %v1207_v57 = vrot.slane %v1200_v53, 7  ;;  %v1209_v59 = vrot.slane %v1201_v55, 6 }
  0x3d   : > { %v817_v46 = vld [vmem:[%s2308_s13 + $0x22] sm:$0x1]  ;;  %v824_v49 = vsel %vm687_vm1, %v823_v43, %v815_v45  ;;  %1895 = vmatpush.msk.msra.mxu0 %vm699_vm4, %v764_v54  ;;  %v1211_v60 = vrot.slane %v1202_v56, 5  ;;  %v1008_v1 = vld [vmem:[%s2308_s13 + $0x15] sm:$0x1]  ;;  %s1933_s24 = smul.u32 48, %s2147_s12 }
  0x3e   : > { %v825_v50 = vrot.slane %v817_v46, 6  ;;  %v1208_v62 = vsel %vm687_vm1, %v1207_v57, %v1199_v52  ;;  %v1183_v2 = vld [vmem:[%s2878_s8] sm:$0x7]  ;;  %v1009_v4 = vld [vmem:[%s2308_s13 + $0x25] sm:$0x1]  ;;  %s1712_s21 = scalar_lea.sflag [#allocation4], %s2304_s23 }
  0x3f   : > { %v1210_v63 = vsel %vm690_vm2, %v1209_v59, %v1208_v62  ;;  %v1503_v3 = vld [vmem:[%s2878_s8] sm:$0x7]  ;;  %v1007_v6 = vld [vmem:[%s2308_s13 + $0x5] sm:$0x1]  ;;  %v1010_v7 = vld [vmem:[%s2308_s13 + $0x35] sm:$0x1]  ;;  %s1725_s27 = scalar_lea.hbm %s2879_s9, %s1933_s24 }
  0x40   : > { %v826_v58 = vsel %vm690_vm2, %v825_v50, %v824_v49  ;;  %v1212_v0 = vsel %vm693_vm3, %v1211_v60, %v1210_v63  ;;  %v1072_v8 = vld [vmem:[%s2308_s13 + $0x16] sm:$0x1]  ;;  %v1456_v10 = vld [vmem:[%s2308_s13 + $0x1c] sm:$0x1]  ;;  %v880_v11 = vld [vmem:[%s2308_s13 + $0x13] sm:$0x1] }
  0x41   : > { %930 = vperm.xlu1 %2007, %v927_v41   ;;  %v828_v61 = vsel %vm693_vm3, %v827_v51, %v826_v58  ;;  %v1071_v13 = vld [vmem:[%s2308_s13 + $0x6] sm:$0x1]  ;;  %v991_v14 = vld [vmem:[%s2878_s8] sm:$0x7]  ;;  %v1019_v16 = vrot.slane %v1010_v7, 5  ;;  %v1079_v18 = vrot.slane %v1072_v8, 7 }
  0x42   : > { %1897 = vmatpush.msk.msra.mxu3 %vm699_vm4, %v828_v61  ;;  %v1375_v15 = vld [vmem:[%s2878_s8] sm:$0x7]  ;;  %v1073_v17 = vld [vmem:[%s2308_s13 + $0x26] sm:$0x1]  ;;  %994 = vperm.xlu2 %2008, %v991_v14   ;;  %v1457_v20 = vld [vmem:[%s2308_s13 + $0x2c] sm:$0x1] }
  0x43   : > { %1887 = vmatmul.msk.f32.vlgmr.msrb.gmra.mxu1 %vm454_vm0, %v481_v5  ;;  %v1015_v5 = vrot.slane %v1008_v1, 7  ;;  %v1695_v19 = vld [vmem:[%s2878_s8] sm:$0x7]  ;;  %v1463_v21 = vrot.slane %v1456_v10, 7  ;;  %v881_v22 = vld [vmem:[%s2308_s13 + $0x23] sm:$0x1]  ;;  %v1080_v30 = vsel %vm687_vm1, %v1079_v18, %v1071_v13 }
  0x44   : > { %1122 = vperm.xlu0 %2006, %v1119_v23   ;;  %1909 = vmatpush.msk.msrb.mxu1 %vm699_vm4, %v1212_v0  ;;  %v887_v23 = vrot.slane %v880_v11, 7  ;;  %v1455_v25 = vld [vmem:[%s2308_s13 + $0xc] sm:$0x1]  ;;  %v879_v26 = vld [vmem:[%s2308_s13 + $0x3] sm:$0x1]  ;;  %v1081_v29 = vrot.slane %v1073_v17, 6 }
  0x45   : > { %v1016_v12 = vsel %vm687_vm1, %v1015_v5, %v1007_v6  ;;  %v453_v27 = vld [vmem:[%s2876_s6] sm:$0x1]  ;;  %v1074_v28 = vld [vmem:[%s2308_s13 + $0x36] sm:$0x1]  ;;  %v1458_v31 = vld [vmem:[%s2308_s13 + $0x3c] sm:$0x1]  ;;  %v1464_v37 = vsel %vm687_vm1, %v1463_v21, %v1455_v25 }
  0x46   : > { %v1465_v32 = vrot.slane %v1457_v20, 6  ;;  %v882_v33 = vld [vmem:[%s2308_s13 + $0x33] sm:$0x1]  ;;  %v889_v34 = vrot.slane %v881_v22, 6  ;;  %v888_v38 = vsel %vm687_vm1, %v887_v23, %v879_v26  ;;  %v1328_v39 = vld [vmem:[%s2308_s13 + $0x1a] sm:$0x1]  ;;  %v1082_v44 = vsel %vm690_vm2, %v1081_v29, %v1080_v30 }
  0x47   : > { %v478_v43 = vld [vmem:[%s2877_s7] sm:$0x7]  ;;  %v1467_v45 = vrot.slane %v1458_v31, 5  ;;  %v891_v46 = vrot.slane %v882_v33, 5  ;;  %v1329_v50 = vld [vmem:[%s2308_s13 + $0x2a] sm:$0x1] }
  0x48   : > { %v1466_v48 = vsel %vm690_vm2, %v1465_v32, %v1464_v37  ;;  %v890_v49 = vsel %vm690_vm2, %v889_v34, %v888_v38  ;;  %v1335_v51 = vrot.slane %v1328_v39, 7  ;;  %v1264_v52 = vld [vmem:[%s2308_s13 + $0x19] sm:$0x1]  ;;  %v1327_v53 = vld [vmem:[%s2308_s13 + $0xa] sm:$0x1]  ;;  %v1337_v61 = vrot.slane %v1329_v50, 6 }
  0x49   : > { %1186 = vperm.xlu1 %2007, %v1183_v2   ;;  %v1055_v54 = vld [vmem:[%s2878_s8] sm:$0x7]  ;;  %v1468_v58 = vsel %vm693_vm3, %v1467_v45, %v1466_v48  ;;  %v892_v59 = vsel %vm693_vm3, %v891_v46, %v890_v49  ;;  %v1330_v60 = vld [vmem:[%s2308_s13 + $0x3a] sm:$0x1]  ;;  %v1265_v62 = vld [vmem:[%s2308_s13 + $0x29] sm:$0x1] }
  0x4a   : > { %v1567_v55 = vld [vmem:[%s2878_s8] sm:$0x7]  ;;  %1058 = vperm.xlu2 %2008, %v1055_v54   ;;  %v1271_v63 = vrot.slane %v1264_v52, 7  ;;  %v1336_v1 = vsel %vm687_vm1, %v1335_v51, %v1327_v53  ;;  %v1263_v2 = vld [vmem:[%s2308_s13 + $0x9] sm:$0x1]  ;;  %v1339_v7 = vrot.slane %v1330_v60, 5 }
  0x4b   : > { %1888 = vmatmul.msk.f32.gmra.mxu1 %vm454_vm0, %v482_v9  ;;  %v1017_v9 = vrot.slane %v1009_v4, 6  ;;  %v1266_v4 = vld [vmem:[%s2308_s13 + $0x39] sm:$0x1]  ;;  %v1584_v5 = vld [vmem:[%s2308_s13 + $0x1e] sm:$0x1]  ;;  %v1273_v8 = vrot.slane %v1265_v62, 6 }
  0x4c   : > { %1314 = vperm.xlu0 %2006, %v1311_v42   ;;  %v1083_v42 = vrot.slane %v1074_v28, 5  ;;  %v1137_v10 = vld [vmem:[%s2308_s13 + $0x27] sm:$0x1]  ;;  %v1272_v11 = vsel %vm687_vm1, %v1271_v63, %v1263_v2  ;;  %v1275_v13 = vrot.slane %v1266_v4, 5  ;;  %v1585_v14 = vld [vmem:[%s2308_s13 + $0x2e] sm:$0x1] }
  0x4d   : > { %v1018_v24 = vsel %vm690_vm2, %v1017_v9, %v1016_v12  ;;  %v1338_v9 = vsel %vm690_vm2, %v1337_v61, %v1336_v1  ;;  %v1586_v17 = vld [vmem:[%s2308_s13 + $0x3e] sm:$0x1]  ;;  %v1247_v18 = vld [vmem:[%s2878_s8] sm:$0x7]  ;;  %v1135_v20 = vld [vmem:[%s2308_s13 + $0x7] sm:$0x1]  ;;  %v1274_v21 = vsel %vm690_vm2, %v1273_v8, %v1272_v11 }
  0x4e   : > { %v1020_v36 = vsel %vm693_vm3, %v1019_v16, %v1018_v24  ;;  %v1084_v57 = vsel %vm693_vm3, %v1083_v42, %v1082_v44  ;;  %v1583_v16 = vld [vmem:[%s2308_s13 + $0xe] sm:$0x1]  ;;  %v1593_v22 = vrot.slane %v1585_v14, 6  ;;  %v1138_v24 = vld [vmem:[%s2308_s13 + $0x37] sm:$0x1]  ;;  %v1145_v25 = vrot.slane %v1137_v10, 6 }
  0x4f   : > { %v1276_v29 = vsel %vm693_vm3, %v1275_v13, %v1274_v21  ;;  %v1647_v30 = vld [vmem:[%s2308_s13 + $0xf] sm:$0x1]  ;;  %v1648_v31 = vld [vmem:[%s2308_s13 + $0x1f] sm:$0x1]  ;;  %v1392_v34 = vld [vmem:[%s2308_s13 + $0x1b] sm:$0x1] }
  0x50   : > { %v1649_v32 = vld [vmem:[%s2308_s13 + $0x2f] sm:$0x1]  ;;  %v1147_v38 = vrot.slane %v1138_v24, 5  ;;  %v1393_v45 = vld [vmem:[%s2308_s13 + $0x2b] sm:$0x1]  ;;  %v1399_v46 = vrot.slane %v1392_v34, 7 }
  0x51   : > { %1378 = vperm.xlu1 %2007, %v1375_v15   ;;  %v1591_v15 = vrot.slane %v1584_v5, 7  ;;  %v1657_v37 = vrot.slane %v1649_v32, 6  ;;  %v1391_v49 = vld [vmem:[%s2308_s13 + $0xb] sm:$0x1]  ;;  %v1521_v52 = vld [vmem:[%s2308_s13 + $0x2d] sm:$0x1] }
  0x52   : > { %1250 = vperm.xlu2 %2008, %v1247_v18   ;;  %v1394_v54 = vld [vmem:[%s2308_s13 + $0x3b] sm:$0x1]  ;;  %v1522_v60 = vld [vmem:[%s2308_s13 + $0x3d] sm:$0x1]  ;;  %v1529_v61 = vrot.slane %v1521_v52, 6  ;;  %s1728_s12 = sshll.u32 %s1725_s27, 4  ;;  %s1729_s12 = int_to_ptr.hbm [resolvable:$true] %s1728_s12 }
  0x53   : > { %v1592_v26 = vsel %vm687_vm1, %v1591_v15, %v1583_v16  ;;  %v1403_v62 = vrot.slane %v1394_v54, 5  ;;  %v1531_v2 = vrot.slane %v1522_v60, 5  ;;  %s2083_s29 = sshra.s32 %s1729_s12, 4  ;;  %s2089_s18 = scalar_lea.hbm %s2879_s9, 96  ;;  %s2084_s29 = int_to_ptr.hbm [resolvable:$true] %s2083_s29 }
  0x54   : > { %1506 = vperm.xlu0 %2006, %v1503_v3   ;;  %v1136_v3 = vld [vmem:[%s2308_s13 + $0x17] sm:$0x1]  ;;  %v1594_v39 = vsel %vm690_vm2, %v1593_v22, %v1592_v26  ;;  %s2085_s19 = scalar_lea.hbm %s2084_s29, 48  ;;  %p2090_p8 = scmp.lt.s32.totalorder %s2084_s29, %s2879_s9 }
  0x55   : > { %v1143_v12 = vrot.slane %v1136_v3, 7  ;;  %p2086_p5 = scmp.ne.s32.totalorder %s2084_s29, %s2085_s19  ;;  %p2091_p10 = scmp.lt.s32.totalorder %s2089_s18, %s2085_s19 }
  0x57   : > { %v1144_v28 = vsel %vm687_vm1, %v1143_v12, %v1135_v20  ;;  %p2087_p6 = pnand %p2086_p5, %p2263_p9  ;;  %p2092_p13 = por %p2091_p10, %p2090_p8 }
  0x58   : > { %v1146_v42 = vsel %vm690_vm2, %v1145_v25, %v1144_v28 }
  0x59   : > { %1570 = vperm.xlu1 %2007, %v1567_v55   ;;  %v1148_v51 = vsel %vm693_vm3, %v1147_v38, %v1146_v42  ;;  %v1401_v55 = vrot.slane %v1393_v45, 6  ;;  %p2088_p7 = pneg %p2087_p6 }
  0x5b   : > { %p2093_p0 = pnand %p2092_p13, %p2088_p7 }
  0x5c   : > { %1698 = vperm.xlu0 %2006, %v1695_v19   ;;  %v1340_v19 = vsel %vm693_vm3, %v1339_v7, %v1338_v9 }
  0x9c   : > { %v2570_v8 = vpop.permute.xlu2 %994 }
  0xa4   : > { %v2585_v13 = vpop.permute.xlu2 %1058 }
  0xb0   : > { %v507_v41 = vpop.f32.mrf.mxu1 }
  0xb1   : > { %1877 = vmatmul.msk.f32.vlgmr.msra.gmra.mxu2 %vm454_vm0, %v507_v41  ;;  %v1439_v41 = vld [vmem:[%s2878_s8] sm:$0x7] }
  0xb2   : > { %v475_v35 = vpop.f32.mrf.mxu0  ;;  %1903 = vmatpush.msk.msra.mxu2 %vm699_vm4, %v1020_v36  ;;  %v1655_v36 = vrot.slane %v1648_v31, 7  ;;  %1442 = vperm.xlu2 %2008, %v1439_v41  }
  0xb3   : > { %v476_v40 = vadd.f32 %v475_v35, %v453_v27  ;;  %v1595_v27 = vrot.slane %v1586_v17, 5  ;;  %v1650_v35 = vld [vmem:[%s2308_s13 + $0x3f] sm:$0x1] }
  0xb4   : > { %v1656_v44 = vsel %vm687_vm1, %v1655_v36, %v1647_v30 }
  0xb5   : > { %v479_v47 = vperm.slane %v476_v40, 0  ;;  %v1659_v40 = vrot.slane %v1650_v35, 5  ;;  %v1596_v48 = vsel %vm693_vm3, %v1595_v27, %v1594_v39  ;;  %v2616_v39 = vpop.permute.xlu2 %1250 }
  0xb6   : > { %v573_v0 = vpop.f32.mrf.mxu3  ;;  %v1252_v42 = vrot.slane %v2616_v39, 1 }
  0xb7   : > { %v2460_v56 = vmul.f32 %v479_v47, %v478_v43  ;;  %1882 = vmatmul.msk.f32.vlgmr.msrb.gmra.mxu0 %vm454_vm0, %v573_v0  ;;  %v1520_v43 = vld [vmem:[%s2308_s13 + $0x1d] sm:$0x1]  ;;  %v1658_v47 = vsel %vm690_vm2, %v1657_v37, %v1656_v44  ;;  %v1631_v0 = vld [vmem:[%s2878_s8] sm:$0x7] }
  0xb8   : > { %v510_v6 = vpop.f32.mrf.mxu1  ;;  %1899 = vmatpush.msk.msrb.mxu0 %vm699_vm4, %v892_v59  ;;  %v1660_v50 = vsel %vm693_vm3, %v1659_v40, %v1658_v47  ;;  %v1527_v53 = vrot.slane %v1520_v43, 7 }
  0xb9   : > { %1894 = vmatmul.msk.f32.vlgmr.msrb.gmra.mxu3 %vm695_vm5, %v2460_v56  ;;  %1902 = vmatmul.msk.f32.vlgmr.msra.gmra.mxu1 %vm695_vm5, %v2460_v56 }
  0xba   : > { %1905 = vmatpush.msk.msrb.mxu3 %vm699_vm4, %v1084_v57  ;;  %1917 = vmatpush.msk.msra.mxu1 %vm699_vm4, %v1468_v58  ;;  %v1519_v57 = vld [vmem:[%s2308_s13 + $0xd] sm:$0x1]  ;;  %v1400_v58 = vsel %vm687_vm1, %v1399_v46, %v1391_v49  ;;  %s1932_s13 = smul.u32 48, %s2304_s23 }
  0xbb   : > { %1878 = vmatmul.msk.f32.gmra.mxu2 %vm454_vm0, %v510_v6  ;;  %v1528_v63 = vsel %vm687_vm1, %v1527_v53, %v1519_v57  ;;  %v1402_v1 = vsel %vm690_vm2, %v1401_v55, %v1400_v58  ;;  %1634 = vperm.xlu2 %2008, %v1631_v0   ;;  %v2566_v6 = vpop.permute.xlu0 %737 }
  0xbc   : > { %v1530_v3 = vsel %vm690_vm2, %v1529_v61, %v1528_v63  ;;  %v1404_v4 = vsel %vm693_vm3, %v1403_v62, %v1402_v1  ;;  %s2577_s17 = scalar_lea.vmem [#allocation7], %s1932_s13  ;;  %v739_v18 = vrot.slane %v2566_v6, 1  ;;  %v997_v61 = vrot.slane %v2570_v8, 2 }
  0xbd   : > { %v1532_v5 = vsel %vm693_vm3, %v1531_v2, %v1530_v3  ;;  %s1726_s28 = sshll.u32 %s2577_s17, 4  ;;  %s1727_s28 = int_to_ptr.vmem [resolvable:$true] %s1726_s28 }
  0xbe   : > { %v576_v23 = vpop.f32.mrf.mxu3 }
  0xbf   : > { %1883 = vmatmul.msk.f32.gmra.mxu0 %vm454_vm0, %v576_v23 }
  0xc0   : > { %v639_v33 = vpop.f32.mrf.mxu1 }
  0xc1   : > { %1898 = vmatmul.msk.f32.vlgmr.msra.gmra.mxu3 %vm695_vm5, %v2460_v56  ;;  %1910 = vmatmul.msk.f32.vlgmr.msrb.gmra.mxu1 %vm695_vm5, %v2460_v56 }
  0xc2   : > { %1913 = vmatpush.msk.msra.mxu3 %vm699_vm4, %v1340_v19  ;;  %v996_v19 = vrot.slane %v2570_v8, 1 }
  0xc3   : > { %1889 = vmatmul.msk.f32.vlgmr.msrb.gmra.mxu2 %vm454_vm0, %v639_v33  ;;  %v2568_v7 = vpop.permute.xlu0 %802  ;;  %v740_v33 = vrot.slane %v2566_v6, 2 }
  0xc4   : > { %1911 = vmatpush.msk.msrb.mxu2 %vm699_vm4, %v1276_v29  ;;  %v804_v37 = vrot.slane %v2568_v7, 1  ;;  %v805_v55 = vrot.slane %v2568_v7, 2 }
  0xc7   : > { %1896 = vmatmul.msk.f32.vlgmr.msra.gmra.mxu0 %vm695_vm5, %v2460_v56 }
  0xc8   : > { %v642_v59 = vpop.f32.mrf.mxu1  ;;  %1907 = vmatpush.msk.msra.mxu0 %vm699_vm4, %v1148_v51 }
  0xc9   : > { %1906 = vmatmul.msk.f32.vlgmr.msrb.gmra.mxu3 %vm695_vm5, %v2460_v56  ;;  %1918 = vmatmul.msk.f32.vlgmr.msra.gmra.mxu1 %vm695_vm5, %v2460_v56 }
  0xca   : > { %1921 = vmatpush.msk.msrb.mxu3 %vm699_vm4, %v1596_v48 }
  0xcb   : > { %1890 = vmatmul.msk.f32.gmra.mxu2 %vm454_vm0, %v642_v59  ;;  %v2573_v9 = vpop.permute.xlu0 %1122 }
  0xcf   : > { %1900 = vmatmul.msk.f32.vlgmr.msrb.gmra.mxu0 %vm695_vm5, %v2460_v56 }
  0xd0   : > { %1915 = vmatpush.msk.msrb.mxu0 %vm699_vm4, %v1404_v4 }
  0xd1   : > { %1914 = vmatmul.msk.f32.vlgmr.msra.gmra.mxu3 %vm695_vm5, %v2460_v56 }
  0xd3   : > { %1904 = vmatmul.msk.f32.vlgmr.msra.gmra.mxu2 %vm695_vm5, %v2460_v56  ;;  %v2597_v24 = vpop.permute.xlu0 %1314 }
  0xd4   : > { %1919 = vmatpush.msk.msra.mxu2 %vm699_vm4, %v1532_v5 }
  0xd7   : > { %1908 = vmatmul.msk.f32.vlgmr.msra.gmra.mxu0 %vm695_vm5, %v2460_v56 }
  0xd8   : > { %1923 = vmatpush.msk.msra.mxu0 %vm699_vm4, %v1660_v50 }
  0xd9   : > { %1922 = vmatmul.msk.f32.vlgmr.msrb.gmra.mxu3 %vm695_vm5, %v2460_v56 }
  0xdb   : > { %1912 = vmatmul.msk.f32.vlgmr.msrb.gmra.mxu2 %vm695_vm5, %v2460_v56  ;;  %v2648_v2 = vpop.permute.xlu0 %1506 }
  0xdf   : > { %1916 = vmatmul.msk.f32.vlgmr.msrb.gmra.mxu0 %vm695_vm5, %v2460_v56 }
  0xe3   : > { %1920 = vmatmul.msk.f32.vlgmr.msra.gmra.mxu2 %vm695_vm5, %v2460_v56 }
  0xe7   : > { %1924 = vmatmul.msk.f32.vlgmr.msra.gmra.mxu0 %vm695_vm5, %v2460_v56  ;;  %v2581_v56 = vpop.permute.xlu1 %866 }
  0xe8   : > { %v868_v38 = vrot.slane %v2581_v56, 1 }
  0xef   : > { %v2610_v34 = vpop.permute.xlu1 %930 }
 0x134   : > { %v537_v11 = vpop.f32.mrf.mxu2  ;;  %v603_v12 = vpop.f32.mrf.mxu0 }
 0x135   : > { %544 = vst.msk [vmem:[%s2577_s17] sm:$0xff] %vm543_vm6, %v537_v11 }
 0x136   : > { %v2575_v10 = vpop.f32.mrf.mxu1  ;;  %1884 = vst.msk [vmem:[%s2577_s17 + $0x10] sm:$0xff] %vm543_vm6, %v603_v12  ;;  %v869_v12 = vrot.slane %v2581_v56, 2 }
 0x137   : > { %v983_v15 = vrot.slane %v2575_v10, 1 }
 0x13c   : > { %v2587_v14 = vpop.f32.mrf.mxu3  ;;  %v979_v20 = vld [vmem:[%s2577_s17 + $0x4] sm:$0x1]  ;;  %v722_v21 = vld [vmem:[%s2577_s17] sm:$0x1]  ;;  %v606_v23 = vpop.f32.mrf.mxu0  ;;  %v851_v41 = vld [vmem:[%s2577_s17 + $0x2] sm:$0x1] }
 0x13d   : > { %v726_v16 = vrot.slane %v2587_v14, 1  ;;  %v980_v25 = vld [vmem:[%s2577_s17 + $0x14] sm:$0x1]  ;;  %v988_v26 = vadd.f32 %v979_v20, %v2575_v10  ;;  %v723_v27 = vld [vmem:[%s2577_s17 + $0x10] sm:$0x1]  ;;  %v731_v28 = vadd.f32 %v722_v21, %v2587_v14  ;;  %1885 = vst.msk [vmem:[%s2577_s17 + $0x18] sm:$0xff] %vm543_vm6, %v606_v23 }
 0x13e   : > { %v2591_v17 = vpop.f32.mrf.mxu1  ;;  %v540_v22 = vpop.f32.mrf.mxu2  ;;  %v989_v29 = vadd.f32 %v983_v15, %v980_v25  ;;  %v852_v46 = vld [vmem:[%s2577_s17 + $0x12] sm:$0x1]  ;;  %v787_v47 = vld [vmem:[%s2577_s17 + $0x1] sm:$0x1]  ;;  %v788_v0 = vld [vmem:[%s2577_s17 + $0x11] sm:$0x1] }
 0x13f   : > { %545 = vst.msk [vmem:[%s2577_s17 + $0x8] sm:$0xff] %vm543_vm6, %v540_v22  ;;  %v732_v30 = vadd.f32 %v726_v16, %v723_v27  ;;  %v1001_v31 = vadd.f32 %v2570_v8, %v988_v26  ;;  %v744_v32 = vadd.f32 %v2566_v6, %v731_v28  ;;  %v1239_v43 = vrot.slane %v2591_v17, 1 }
 0x140   : > { %v1002_v35 = vadd.f32 %v996_v19, %v989_v29  ;;  %v1508_v15 = vrot.slane %v2648_v2, 1  ;;  %v984_v19 = vrot.slane %v2575_v10, 2  ;;  %v727_v20 = vrot.slane %v2587_v14, 2  ;;  %v2666_v10 = vpop.permute.xlu1 %1186 }
 0x141   : > { %v745_v36 = vadd.f32 %v739_v18, %v732_v30  ;;  %1004 = vst.msk [vmem:[%s2577_s17 + $0x4] sm:$0x1] %vm747_vm7, %v1001_v31  ;;  %v1108_v30 = vld [vmem:[%s2577_s17 + $0x16] sm:$0x1] }
 0x142   : > { %1005 = vst.msk [vmem:[%s2577_s17 + $0x14] sm:$0x1] %vm747_vm7, %v1002_v35 }
 0x143   : > { %748 = vst.msk [vmem:[%s2577_s17] sm:$0x1] %vm747_vm7, %v744_v32 }
 0x144   : > { %v2618_v40 = vpop.f32.mrf.mxu3  ;;  %749 = vst.msk [vmem:[%s2577_s17 + $0x10] sm:$0x1] %vm747_vm7, %v745_v36  ;;  %v784_v53 = vpop.f32.mrf.mxu0  ;;  %v1236_v57 = vld [vmem:[%s2577_s17 + $0x18] sm:$0x1]  ;;  %v1492_v11 = vld [vmem:[%s2577_s17 + $0x1c] sm:$0x1] }
 0x145   : > { %v855_v44 = vrot.slane %v2618_v40, 1  ;;  %v860_v45 = vadd.f32 %v851_v41, %v2618_v40  ;;  %v791_v59 = vrot.slane %v784_v53, 1  ;;  %v796_v60 = vadd.f32 %v787_v47, %v784_v53 }
 0x146   : > { %v2631_v48 = vpop.f32.mrf.mxu1  ;;  %v1235_v49 = vld [vmem:[%s2577_s17 + $0x8] sm:$0x1]  ;;  %v669_v52 = vpop.f32.mrf.mxu2  ;;  %v1491_v54 = vld [vmem:[%s2577_s17 + $0xc] sm:$0x1]  ;;  %v1245_v62 = vadd.f32 %v1239_v43, %v1236_v57  ;;  %v856_v14 = vrot.slane %v2618_v40, 2  ;;  %v792_v28 = vrot.slane %v784_v53, 2 }
 0x147   : > { %v861_v50 = vadd.f32 %v855_v44, %v852_v46  ;;  %v873_v51 = vadd.f32 %v2581_v56, %v860_v45  ;;  %v1244_v58 = vadd.f32 %v1235_v49, %v2591_v17  ;;  %1891 = vst.msk [vmem:[%s2577_s17 + $0x20] sm:$0xff] %vm543_vm6, %v669_v52  ;;  %v1495_v1 = vrot.slane %v2631_v48, 1  ;;  %v1107_v56 = vld [vmem:[%s2577_s17 + $0x6] sm:$0x1] }
 0x148   : > { %v797_v4 = vadd.f32 %v791_v59, %v788_v0  ;;  %v809_v5 = vadd.f32 %v2568_v7, %v796_v60  ;;  %v1500_v8 = vadd.f32 %v1491_v54, %v2631_v48  ;;  %v1258_v16 = vadd.f32 %v1252_v42, %v1245_v62  ;;  %v915_v54 = vld [vmem:[%s2577_s17 + $0x3] sm:$0x1]  ;;  %v916_v60 = vld [vmem:[%s2577_s17 + $0x13] sm:$0x1] }
 0x149   : > { %v874_v63 = vadd.f32 %v868_v38, %v861_v50  ;;  %876 = vst.msk [vmem:[%s2577_s17 + $0x2] sm:$0x1] %vm747_vm7, %v873_v51  ;;  %v1257_v3 = vadd.f32 %v2616_v39, %v1244_v58  ;;  %v1501_v18 = vadd.f32 %v1495_v1, %v1492_v11  ;;  %v1124_v46 = vrot.slane %v2573_v9, 1 }
 0x14a   : > { %v810_v21 = vadd.f32 %v804_v37, %v797_v4  ;;  %1261 = vst.msk [vmem:[%s2577_s17 + $0x18] sm:$0x1] %vm747_vm7, %v1258_v16  ;;  %v1513_v23 = vadd.f32 %v2648_v2, %v1500_v8  ;;  %v1125_v58 = vrot.slane %v2573_v9, 2  ;;  %v932_v1 = vrot.slane %v2610_v34, 1 }
 0x14b   : > { %877 = vst.msk [vmem:[%s2577_s17 + $0x12] sm:$0x1] %vm747_vm7, %v874_v63  ;;  %v1514_v29 = vadd.f32 %v1508_v15, %v1501_v18  ;;  %v1043_v15 = vld [vmem:[%s2577_s17 + $0x5] sm:$0x1]  ;;  %v2713_v18 = vpop.permute.xlu2 %1442 }
 0x14c   : > { %1260 = vst.msk [vmem:[%s2577_s17 + $0x8] sm:$0x1] %vm747_vm7, %v1257_v3  ;;  %v1104_v22 = vpop.f32.mrf.mxu3  ;;  %v912_v38 = vpop.f32.mrf.mxu0  ;;  %v1364_v3 = vld [vmem:[%s2577_s17 + $0x1a] sm:$0x1] }
 0x14d   : > { %v1111_v25 = vrot.slane %v1104_v22, 1  ;;  %v1112_v26 = vrot.slane %v1104_v22, 2  ;;  %v1116_v27 = vadd.f32 %v1107_v56, %v1104_v22  ;;  %812 = vst.msk [vmem:[%s2577_s17 + $0x1] sm:$0x1] %vm747_vm7, %v809_v5  ;;  %v919_v50 = vrot.slane %v912_v38, 1 }
 0x14e   : > { %v724_v31 = vld [vmem:[%s2577_s17 + $0x20] sm:$0x1]  ;;  %v853_v32 = vld [vmem:[%s2577_s17 + $0x22] sm:$0x1]  ;;  %v981_v35 = vld [vmem:[%s2577_s17 + $0x24] sm:$0x1]  ;;  %v672_v37 = vpop.f32.mrf.mxu2  ;;  %v924_v6 = vadd.f32 %v915_v54, %v912_v38 }
 0x14f   : > { %v1129_v36 = vadd.f32 %v2573_v9, %v1116_v27  ;;  %v733_v41 = vadd.f32 %v727_v20, %v724_v31  ;;  %v862_v42 = vadd.f32 %v856_v14, %v853_v32  ;;  %v990_v43 = vadd.f32 %v984_v19, %v981_v35  ;;  %v789_v40 = vld [vmem:[%s2577_s17 + $0x21] sm:$0x1]  ;;  %813 = vst.msk [vmem:[%s2577_s17 + $0x11] sm:$0x1] %vm747_vm7, %v810_v21  ;;  %v1109_v44 = vld [vmem:[%s2577_s17 + $0x26] sm:$0x1]  ;;  %v2715_v19 = vpop.permute.xlu1 %1378 }
 0x150   : > { %v1117_v45 = vadd.f32 %v1111_v25, %v1108_v30  ;;  %v798_v47 = vadd.f32 %v792_v28, %v789_v40  ;;  %1516 = vst.msk [vmem:[%s2577_s17 + $0xc] sm:$0x1] %vm747_vm7, %v1513_v23  ;;  %v1118_v49 = vadd.f32 %v1112_v26, %v1109_v44  ;;  %v920_v57 = vrot.slane %v912_v38, 2  ;;  %v1044_v25 = vld [vmem:[%s2577_s17 + $0x15] sm:$0x1] }
 0x151   : > { %v746_v51 = vadd.f32 %v740_v33, %v733_v41  ;;  %v875_v52 = vadd.f32 %v869_v12, %v862_v42  ;;  %v1003_v53 = vadd.f32 %v997_v61, %v990_v43  ;;  %1517 = vst.msk [vmem:[%s2577_s17 + $0x1c] sm:$0x1] %vm747_vm7, %v1514_v29  ;;  %v917_v61 = vld [vmem:[%s2577_s17 + $0x23] sm:$0x1]  ;;  %v925_v62 = vadd.f32 %v919_v50, %v916_v60  ;;  %v1045_v14 = vld [vmem:[%s2577_s17 + $0x25] sm:$0x1] }
 0x152   : > { %v811_v59 = vadd.f32 %v805_v55, %v798_v47  ;;  %1132 = vst.msk [vmem:[%s2577_s17 + $0x6] sm:$0x1] %vm747_vm7, %v1129_v36  ;;  %v1130_v33 = vadd.f32 %v1124_v46, %v1117_v45  ;;  %v1131_v9 = vadd.f32 %v1125_v58, %v1118_v49  ;;  %v926_v7 = vadd.f32 %v920_v57, %v917_v61  ;;  %v1363_v55 = vld [vmem:[%s2577_s17 + $0xa] sm:$0x1]  ;;  %v1171_v31 = vld [vmem:[%s2577_s17 + $0x7] sm:$0x1] }
 0x153   : > { %750 = vst.msk [vmem:[%s2577_s17 + $0x20] sm:$0x1] %vm747_vm7, %v746_v51  ;;  %v933_v5 = vrot.slane %v2610_v34, 2  ;;  %v937_v11 = vadd.f32 %v2610_v34, %v924_v6  ;;  %v938_v20 = vadd.f32 %v932_v1, %v925_v62  ;;  %v1380_v34 = vrot.slane %v2715_v19, 1  ;;  %v1619_v49 = vld [vmem:[%s2577_s17 + $0xe] sm:$0x1]  ;;  %v1635_v62 = vpop.permute.xlu2 %1634 }
 0x154   : > { %v2697_v63 = vpop.f32.mrf.mxu3  ;;  %878 = vst.msk [vmem:[%s2577_s17 + $0x22] sm:$0x1] %vm747_vm7, %v875_v52  ;;  %v1168_v16 = vpop.f32.mrf.mxu0  ;;  %v1060_v32 = vrot.slane %v2585_v13, 1  ;;  %v1061_v35 = vrot.slane %v2585_v13, 2  ;;  %v1253_v42 = vrot.slane %v2616_v39, 2  ;;  %v1509_v43 = vrot.slane %v2648_v2, 2 }
 0x155   : > { %v1367_v0 = vrot.slane %v2697_v63, 1  ;;  %1006 = vst.msk [vmem:[%s2577_s17 + $0x24] sm:$0x1] %vm747_vm7, %v1003_v53  ;;  %v1372_v4 = vadd.f32 %v1363_v55, %v2697_v63  ;;  %v939_v23 = vadd.f32 %v933_v5, %v926_v7  ;;  %v1175_v26 = vrot.slane %v1168_v16, 1  ;;  %v1173_v54 = vld [vmem:[%s2577_s17 + $0x27] sm:$0x1] }
 0x156   : > { %814 = vst.msk [vmem:[%s2577_s17 + $0x21] sm:$0x1] %vm747_vm7, %v811_v59  ;;  %v1040_v12 = vpop.f32.mrf.mxu2  ;;  %v1180_v38 = vadd.f32 %v1171_v31, %v1168_v16  ;;  %v1176_v40 = vrot.slane %v1168_v16, 2  ;;  %v1188_v45 = vrot.slane %v2666_v10, 1  ;;  %v1381_v46 = vrot.slane %v2715_v19, 2 }
 0x157   : > { %v1373_v8 = vadd.f32 %v1367_v0, %v1364_v3  ;;  %1133 = vst.msk [vmem:[%s2577_s17 + $0x16] sm:$0x1] %vm747_vm7, %v1130_v33  ;;  %v1047_v21 = vrot.slane %v1040_v12, 1  ;;  %v1048_v22 = vrot.slane %v1040_v12, 2  ;;  %v1052_v56 = vadd.f32 %v1043_v15, %v1040_v12  ;;  %v1620_v7 = vld [vmem:[%s2577_s17 + $0x1e] sm:$0x1] }
 0x158   : > { %1134 = vst.msk [vmem:[%s2577_s17 + $0x26] sm:$0x1] %vm747_vm7, %v1131_v9  ;;  %v1385_v27 = vadd.f32 %v2715_v19, %v1372_v4  ;;  %v1240_v2 = vrot.slane %v2591_v17, 2  ;;  %v1496_v53 = vrot.slane %v2631_v48, 2  ;;  %v1193_v57 = vadd.f32 %v2666_v10, %v1180_v38  ;;  %v1299_v15 = vld [vmem:[%s2577_s17 + $0x9] sm:$0x1] }
 0x159   : > { %1892 = vst.msk [vmem:[%s2577_s17 + $0x28] sm:$0xff] %vm543_vm6, %v672_v37  ;;  %v1053_v28 = vadd.f32 %v1047_v21, %v1044_v25  ;;  %v1386_v29 = vadd.f32 %v1380_v34, %v1373_v8  ;;  %v1054_v30 = vadd.f32 %v1048_v22, %v1045_v14  ;;  %v1065_v36 = vadd.f32 %v2585_v13, %v1052_v56  ;;  %v1172_v37 = vld [vmem:[%s2577_s17 + $0x17] sm:$0x1]  ;;  %v1427_v14 = vld [vmem:[%s2577_s17 + $0xb] sm:$0x1] }
 0x15a   : > { %940 = vst.msk [vmem:[%s2577_s17 + $0x3] sm:$0x1] %vm747_vm7, %v937_v11  ;;  %v1181_v44 = vadd.f32 %v1175_v26, %v1172_v37  ;;  %v1368_v13 = vrot.slane %v2697_v63, 2  ;;  %v1182_v6 = vadd.f32 %v1176_v40, %v1173_v54  ;;  %v1189_v0 = vrot.slane %v2666_v10, 2  ;;  %v1300_v10 = vld [vmem:[%s2577_s17 + $0x19] sm:$0x1] }
 0x15b   : > { %941 = vst.msk [vmem:[%s2577_s17 + $0x13] sm:$0x1] %vm747_vm7, %v938_v20  ;;  %v1066_v39 = vadd.f32 %v1060_v32, %v1053_v28  ;;  %v1067_v47 = vadd.f32 %v1061_v35, %v1054_v30  ;;  %v1636_v16 = vrot.slane %v1635_v62, 1  ;;  %v1637_v22 = vrot.slane %v1635_v62, 2  ;;  %v1428_v31 = vld [vmem:[%s2577_s17 + $0x1b] sm:$0x1] }
 0x15c   : > { %v1616_v41 = vpop.f32.mrf.mxu3  ;;  %942 = vst.msk [vmem:[%s2577_s17 + $0x23] sm:$0x1] %vm747_vm7, %v939_v23  ;;  %v2749_v52 = vpop.f32.mrf.mxu0  ;;  %v1194_v33 = vadd.f32 %v1188_v45, %v1181_v44  ;;  %v1195_v19 = vadd.f32 %v1189_v0, %v1182_v6  ;;  %v1317_v37 = vrot.slane %v2597_v24, 2  ;;  %v1555_v45 = vld [vmem:[%s2577_s17 + $0xd] sm:$0x1] }
 0x15d   : > { %1388 = vst.msk [vmem:[%s2577_s17 + $0xa] sm:$0x1] %vm747_vm7, %v1385_v27  ;;  %v1623_v50 = vrot.slane %v1616_v41, 1  ;;  %v1624_v58 = vrot.slane %v1616_v41, 2  ;;  %v1628_v61 = vadd.f32 %v1619_v49, %v1616_v41  ;;  %v1431_v21 = vrot.slane %v2749_v52, 1 }
 0x15e   : > { %1389 = vst.msk [vmem:[%s2577_s17 + $0x1a] sm:$0x1] %vm747_vm7, %v1386_v29  ;;  %v1296_v51 = vpop.f32.mrf.mxu2  ;;  %v1432_v25 = vrot.slane %v2749_v52, 2  ;;  %v1316_v29 = vrot.slane %v2597_v24, 1  ;;  %v1436_v32 = vadd.f32 %v1427_v14, %v2749_v52  ;;  %v1445_v49 = vrot.slane %v2713_v18, 2 }
 0x15f   : > { %1068 = vst.msk [vmem:[%s2577_s17 + $0x5] sm:$0x1] %vm747_vm7, %v1065_v36  ;;  %v1303_v55 = vrot.slane %v1296_v51, 1  ;;  %v1629_v3 = vadd.f32 %v1623_v50, %v1620_v7  ;;  %v1304_v4 = vrot.slane %v1296_v51, 2  ;;  %v1308_v20 = vadd.f32 %v1299_v15, %v1296_v51  ;;  %v1684_v6 = vld [vmem:[%s2577_s17 + $0x1f] sm:$0x1] }
 0x160   : > { %v1237_v17 = vld [vmem:[%s2577_s17 + $0x28] sm:$0x1]  ;;  %v1493_v59 = vld [vmem:[%s2577_s17 + $0x2c] sm:$0x1]  ;;  %v1365_v60 = vld [vmem:[%s2577_s17 + $0x2a] sm:$0x1]  ;;  %v1641_v56 = vadd.f32 %v1635_v62, %v1628_v61  ;;  %v1449_v50 = vadd.f32 %v2713_v18, %v1436_v32 }
 0x161   : > { %v1246_v63 = vadd.f32 %v1240_v2, %v1237_v17  ;;  %v1502_v48 = vadd.f32 %v1496_v53, %v1493_v59  ;;  %v1374_v9 = vadd.f32 %v1368_v13, %v1365_v60  ;;  %1069 = vst.msk [vmem:[%s2577_s17 + $0x15] sm:$0x1] %vm747_vm7, %v1066_v39  ;;  %v1621_v1 = vld [vmem:[%s2577_s17 + $0x2e] sm:$0x1]  ;;  %v1301_v34 = vld [vmem:[%s2577_s17 + $0x29] sm:$0x1]  ;;  %v1309_v23 = vadd.f32 %v1303_v55, %v1300_v10  ;;  %v1571_v13 = vpop.permute.xlu1 %1570  ;;  %v1699_v17 = vpop.permute.xlu0 %1698 }
 0x162   : > { %1070 = vst.msk [vmem:[%s2577_s17 + $0x25] sm:$0x1] %vm747_vm7, %v1067_v47  ;;  %v1630_v12 = vadd.f32 %v1624_v58, %v1621_v1  ;;  %v1642_v26 = vadd.f32 %v1636_v16, %v1629_v3  ;;  %v1310_v27 = vadd.f32 %v1304_v4, %v1301_v34  ;;  %v1321_v38 = vadd.f32 %v2597_v24, %v1308_v20  ;;  %v1429_v41 = vld [vmem:[%s2577_s17 + $0x2b] sm:$0x1]  ;;  %v1556_v24 = vld [vmem:[%s2577_s17 + $0x1d] sm:$0x1] }
 0x163   : > { %v1259_v5 = vadd.f32 %v1253_v42, %v1246_v63  ;;  %v1515_v11 = vadd.f32 %v1509_v43, %v1502_v48  ;;  %v1387_v8 = vadd.f32 %v1381_v46, %v1374_v9  ;;  %1196 = vst.msk [vmem:[%s2577_s17 + $0x7] sm:$0x1] %vm747_vm7, %v1193_v57  ;;  %v1437_v42 = vadd.f32 %v1431_v21, %v1428_v31  ;;  %v1557_v51 = vld [vmem:[%s2577_s17 + $0x2d] sm:$0x1]  ;;  %v1683_v58 = vld [vmem:[%s2577_s17 + $0xf] sm:$0x1] }
 0x164   : > { %1197 = vst.msk [vmem:[%s2577_s17 + $0x17] sm:$0x1] %vm747_vm7, %v1194_v33  ;;  %v1643_v30 = vadd.f32 %v1637_v22, %v1630_v12  ;;  %v1680_v36 = vpop.f32.mrf.mxu0  ;;  %v1322_v40 = vadd.f32 %v1316_v29, %v1309_v23  ;;  %v1438_v44 = vadd.f32 %v1432_v25, %v1429_v41  ;;  %v1444_v46 = vrot.slane %v2713_v18, 1  ;;  %v1685_v62 = vld [vmem:[%s2577_s17 + $0x2f] sm:$0x1] }
 0x165   : > { %1262 = vst.msk [vmem:[%s2577_s17 + $0x28] sm:$0x1] %vm747_vm7, %v1259_v5  ;;  %v1323_v39 = vadd.f32 %v1317_v37, %v1310_v27  ;;  %v1687_v47 = vrot.slane %v1680_v36, 1  ;;  %v1688_v53 = vrot.slane %v1680_v36, 2  ;;  %v1572_v59 = vrot.slane %v1571_v13, 1 }
 0x166   : > { %1518 = vst.msk [vmem:[%s2577_s17 + $0x2c] sm:$0x1] %vm747_vm7, %v1515_v11  ;;  %v1552_v28 = vpop.f32.mrf.mxu2  ;;  %v1450_v54 = vadd.f32 %v1444_v46, %v1437_v42  ;;  %v1451_v60 = vadd.f32 %v1445_v49, %v1438_v44  ;;  %v1692_v18 = vadd.f32 %v1683_v58, %v1680_v36  ;;  %v1573_v33 = vrot.slane %v1571_v13, 2 }
 0x167   : > { %1390 = vst.msk [vmem:[%s2577_s17 + $0x2a] sm:$0x1] %vm747_vm7, %v1387_v8  ;;  %v1559_v35 = vrot.slane %v1552_v28, 1  ;;  %v1560_v43 = vrot.slane %v1552_v28, 2  ;;  %v1564_v2 = vadd.f32 %v1555_v45, %v1552_v28  ;;  %v1693_v63 = vadd.f32 %v1687_v47, %v1684_v6 }
 0x168   : > { %1198 = vst.msk [vmem:[%s2577_s17 + $0x27] sm:$0x1] %vm747_vm7, %v1195_v19  ;;  %v1694_v9 = vadd.f32 %v1688_v53, %v1685_v62  ;;  %v1700_v7 = vrot.slane %v1699_v17, 1  ;;  %v1701_v0 = vrot.slane %v1699_v17, 2  ;;  %v1705_v1 = vadd.f32 %v1699_v17, %v1692_v18 }
 0x169   : > { %1644 = vst.msk [vmem:[%s2577_s17 + $0xe] sm:$0x1] %vm747_vm7, %v1641_v56  ;;  %v1565_v52 = vadd.f32 %v1559_v35, %v1556_v24  ;;  %v1566_v57 = vadd.f32 %v1560_v43, %v1557_v51  ;;  %v1577_v61 = vadd.f32 %v1571_v13, %v1564_v2 }
 0x16a   : > { %1645 = vst.msk [vmem:[%s2577_s17 + $0x1e] sm:$0x1] %vm747_vm7, %v1642_v26  ;;  %v1706_v3 = vadd.f32 %v1700_v7, %v1693_v63  ;;  %v1707_v4 = vadd.f32 %v1701_v0, %v1694_v9 }
 0x16b   : > { %1646 = vst.msk [vmem:[%s2577_s17 + $0x2e] sm:$0x1] %vm747_vm7, %v1643_v30  ;;  %v1578_v48 = vadd.f32 %v1572_v59, %v1565_v52  ;;  %v1579_v55 = vadd.f32 %v1573_v33, %v1566_v57 }
 0x16c   : > { %1324 = vst.msk [vmem:[%s2577_s17 + $0x9] sm:$0x1] %vm747_vm7, %v1321_v38 }
 0x16d   : > { %1325 = vst.msk [vmem:[%s2577_s17 + $0x19] sm:$0x1] %vm747_vm7, %v1322_v40 }
 0x16e   : > { %1326 = vst.msk [vmem:[%s2577_s17 + $0x29] sm:$0x1] %vm747_vm7, %v1323_v39 }
 0x16f   : > { %1452 = vst.msk [vmem:[%s2577_s17 + $0xb] sm:$0x1] %vm747_vm7, %v1449_v50 }
 0x170   : > { %1453 = vst.msk [vmem:[%s2577_s17 + $0x1b] sm:$0x1] %vm747_vm7, %v1450_v54 }
 0x171   : > { %1454 = vst.msk [vmem:[%s2577_s17 + $0x2b] sm:$0x1] %vm747_vm7, %v1451_v60 }
 0x172   : > { %1580 = vst.msk [vmem:[%s2577_s17 + $0xd] sm:$0x1] %vm747_vm7, %v1577_v61 }
 0x173   : > { %1581 = vst.msk [vmem:[%s2577_s17 + $0x1d] sm:$0x1] %vm747_vm7, %v1578_v48 }
 0x174   : > { %1582 = vst.msk [vmem:[%s2577_s17 + $0x2d] sm:$0x1] %vm747_vm7, %v1579_v55 }
 0x175   : > { %1708 = vst.msk [vmem:[%s2577_s17 + $0xf] sm:$0x1] %vm747_vm7, %v1705_v1 }
 0x176   : > { %1709 = vst.msk [vmem:[%s2577_s17 + $0x1f] sm:$0x1] %vm747_vm7, %v1706_v3 }
 0x177   : > { %1710 = vst.msk [vmem:[%s2577_s17 + $0x2f] sm:$0x1] %vm747_vm7, %v1707_v4 }
 0x178   : > { %2096 = shalt.err (!%p2093_p0)
}
 0x179   : > { %s2160_s23 = smov 128   ;;  %s2161_s30 = smov 8  }
 0x17a   : > { %1938 = dma.vmem_to_hbm [thread:$0]  (%p2263_p9), %s1727_s28, 768, %s1729_s12, %s1712_s21, %s2160_s23, %s2160_s23, %s2161_s30  }
 0x17b PF: > { %s2898_s11 = sld [smem:[#allocation11_spill]]  ;;  %p1948_p1 = pnand %p1867_p12, %p2270_p11 }
 0x17d   : > { %p1949_p2 = pneg %p1948_p1 }
 0x181   : > { %s1743_s17 = sand.u32 1, %s2898_s11  }
 0x182   : > { %s1744_s24 = scalar_lea.sflag [#allocation4], %s1743_s17 }
 0x183   : > { %2130 = dma.done.wait (%p1949_p2), %s1744_s24, 768  }
 0x184   : > { %2132 = vsyncadd (%p1949_p2), %s1744_s24, 4294966528  ;;  %s28_s14 = sadd.s32 1, %s2155_s14   ;;  %s2900_s25 = sld [smem:[#allocation12_spill]] }
 0x185   : > { %p25_p3 = scmp.ge.s32.totalorder %s28_s14, 4   ;;  %s2901_s11 = sld [smem:[#allocation15_spill]] }
 0x186   : > { %s2902_s12 = sld [smem:[#allocation13_spill]]  ;;  %s2904_s30 = smov %s2139_s10 }
 0x187   : > { %s2903_s13 = sld [smem:[#allocation14_spill]]  ;;  %27 = sbr.rel (!%p25_p3) target bundleno = 10 (0xa), region = 124 }
 0x18a   : > { %s2905_s10 = smov %s2900_s25 }
 0x18c   :  { %1750 = vsyncpa [#allocation3], 1 }
 0x18d   :  { %1752 = vsyncpa [#allocation3 + $0x1], 1 }
 0x18e   :  { %1753 = vsyncpa [#allocation6], 1 }
 0x18f   :  { %1755 = vsyncpa [#allocation6 + $0x1], 1 }
 0x190   :  { %1756 = vsyncpa [#allocation4], 1 }
 0x191   :  { %1758 = vsyncpa [#allocation4 + $0x1], 1 }

</bundles_post_ra>
